<compile_context>
chip_gen: v6e
topology: v6e:2x2x1
jax: 0.10.0
libtpu: 0.0.40
codegen_flags: <defaults>
</compile_context>

<pallas_src>
import functools

import jax
import jax.numpy as jnp
from jax.experimental import pallas as pl
from jax.experimental.pallas import tpu as pltpu


def _store_padded(dst_ref, center, *, p, C, H, W):
    """Write `center` (nb, H, W*C) into dst_ref (nb, H+2p, (W+2p)*C) with a zero halo."""
    nb, Hp, WpC = dst_ref.shape
    WC = W * C
    if p > 0:
        zrow = jnp.zeros((nb, p, WpC), dst_ref.dtype)
        dst_ref[:, 0:p, :] = zrow                      # top halo rows
        dst_ref[:, Hp - p:Hp, :] = zrow                # bottom halo rows
        zcol = jnp.zeros((nb, Hp, p * C), dst_ref.dtype)
        dst_ref[:, :, 0:p * C] = zcol                  # left halo lanes
        dst_ref[:, :, WpC - p * C:WpC] = zcol          # right halo lanes
    dst_ref[:, p:p + H, p * C:p * C + WC] = center


def _dwconv_from_padded(padded, w_ref, *, K, C, H, W):
    """Depthwise KxK conv of a zero-padded (nb, H+2p, (W+2p)*C) value.

    kw lane shifts are hoisted out of the kh loop (K cross-lane slices total,
    each reused across K cheap sublane slices).  Accumulator stays a value so
    Mosaic keeps it vreg-resident; initialised with the first tap (no zeros+add).
    """
    WC = W * C
    acc = None
    for kw in range(K):
        xs = padded[:, :, kw * C:kw * C + WC]          # hoisted lane shift
        for kh in range(K):
            t = w_ref[kh, kw, :] * xs[:, kh:kh + H, :]  # sublane slice per tap
            acc = t if acc is None else acc + t
    return acc


def _resblock_kernel(x_ref, w1_ref, w2_ref, out_ref, xp_ref, ip_ref,
                     *, K, C, H, W, p):
    """Fused: pad -> conv1 -> relu -> pad -> conv2 -> +residual -> relu.

    x_ref   : (nb, H, W*C)              unpadded input, lane = w*C + c
    w1_ref  : (K, K, W*C)               conv1 weights, broadcast over w
    w2_ref  : (K, K, W*C)               conv2 weights, broadcast over w
    out_ref : (nb, H, W*C)
    xp_ref  : (nb, H+2p, (W+2p)*C) VMEM scratch (zero-padded input)
    ip_ref  : (nb, H+2p, (W+2p)*C) VMEM scratch (zero-padded relu(conv1))
    """
    x = x_ref[...].astype(jnp.float32)                 # aligned, lane-dense

    # conv1 over the zero-padded input scratch.
    _store_padded(xp_ref, x, p=p, C=C, H=H, W=W)
    inter = _dwconv_from_padded(xp_ref[...], w1_ref, K=K, C=C, H=H, W=W)
    inter = jnp.maximum(inter, 0.0)                    # ReLU

    # conv2 over the zero-padded intermediate (exactly PyTorch's padded input).
    _store_padded(ip_ref, inter, p=p, C=C, H=H, W=W)
    acc = _dwconv_from_padded(ip_ref[...], w2_ref, K=K, C=C, H=H, W=W)

    # Residual (aligned input block) + final ReLU.
    out_ref[...] = jnp.maximum(acc + x, 0.0).astype(out_ref.dtype)


def _choose_block_n(N, H, W, C, p, dtype_bytes=4, vmem_budget=16 << 20):
    """Largest batch block fitting the VMEM budget, preferring >=2 grid steps
    so both v7x TensorCores get work under 'parallel' semantics."""
    Hp, WpC, WC = H + 2 * p, (W + 2 * p) * C, W * C
    per_batch = (
        2 * dtype_bytes * H * WC        # input block (double-buffered)
        + 2 * dtype_bytes * H * WC      # output block (double-buffered)
        + 2 * 4 * Hp * WpC              # two f32 padded VMEM scratches
        + 4 * 4 * H * WC)               # headroom for value intermediates
    divisors = [d for d in range(1, N + 1) if N % d == 0]
    fits = [d for d in divisors if d * per_batch <= vmem_budget] or [1]
    multi = [d for d in fits if N // d >= 2]
    return max(multi) if multi else max(fits)


def resblock_pallas(x_nchw, w1, w2, *, kernel_size, stride, padding,
                    block_n=None):
    """x_nchw: (N, C, H, W); w1, w2: PyTorch depthwise weights (C, 1, K, K)."""
    assert stride == 1, "residual add requires stride == 1"
    K, p = kernel_size, padding
    assert 2 * p == K - 1, "residual add requires 'same' padding"

    N, C, H, W = x_nchw.shape
    WC = W * C
    Hp, WpC = H + 2 * p, (W + 2 * p) * C
    # NOTE: best perf wants W*C % 128 == 0 (unmasked lane-dense stores); other
    # shapes are still correct, just use masked partial stores.

    # ---- layout plumbing (one transpose; no HBM-side padding) ----
    # TODO(synk): fold this transpose into the kernel's DMA to drop the last extra pass.
    xflat = jnp.transpose(x_nchw, (0, 2, 3, 1)).reshape(N, H, WC)   # lane = w*C + c

    # (C,1,K,K) -> (K,K,C) -> broadcast over w to the full output lane width.
    w1_kkc = jnp.transpose(w1[:, 0, :, :], (1, 2, 0))
    w2_kkc = jnp.transpose(w2[:, 0, :, :], (1, 2, 0))
    w1_lane = jnp.broadcast_to(w1_kkc[:, :, None, :], (K, K, W, C)).reshape(K, K, WC)
    w2_lane = jnp.broadcast_to(w2_kkc[:, :, None, :], (K, K, W, C)).reshape(K, K, WC)

    dtype_bytes = jnp.dtype(x_nchw.dtype).itemsize
    nb = (_choose_block_n(N, H, W, C, p, dtype_bytes=dtype_bytes)
          if block_n is None else block_n)
    assert N % nb == 0, "batch must be divisible by the batch block"

    kernel = functools.partial(_resblock_kernel, K=K, C=C, H=H, W=W, p=p)

    out_flat = pl.pallas_call(
        kernel,
        out_shape=jax.ShapeDtypeStruct((N, H, WC), x_nchw.dtype),
        grid_spec=pltpu.PrefetchScalarGridSpec(
            num_scalar_prefetch=0,
            grid=(N // nb,),
            in_specs=[
                pl.BlockSpec((nb, H, WC), lambda n: (n, 0, 0)),
                pl.BlockSpec((K, K, WC), lambda n: (0, 0, 0)),
                pl.BlockSpec((K, K, WC), lambda n: (0, 0, 0)),
            ],
            out_specs=pl.BlockSpec((nb, H, WC), lambda n: (n, 0, 0)),
            scratch_shapes=[
                pltpu.VMEM((nb, Hp, WpC), jnp.float32),   # padded input
                pltpu.VMEM((nb, Hp, WpC), jnp.float32),   # padded relu(conv1)
            ],
        ),
        compiler_params=pltpu.CompilerParams(
            dimension_semantics=("parallel",),
            vmem_limit_bytes=32 * 1024 * 1024),
    )(xflat, w1_lane, w2_lane)

    # lane-dense -> NCHW
    return jnp.transpose(out_flat.reshape(N, H, W, C), (0, 3, 1, 2))


def _reference_resblock(x_nchw, w1, w2, *, padding):
    """Pure-JAX reference mirroring the PyTorch module (for verification)."""
    C = x_nchw.shape[1]

    def dwconv(x, w):
        rhs = jnp.transpose(w, (2, 3, 1, 0))   # (C,1,K,K) -> HWIO (K,K,1,C)
        return jax.lax.conv_general_dilated(
            x, rhs, window_strides=(1, 1),
            padding=((padding, padding), (padding, padding)),
            dimension_numbers=("NCHW", "HWIO", "NCHW"),
            feature_group_count=C)

    out = jax.nn.relu(dwconv(x_nchw, w1))
    out = dwconv(out, w2)
    return jax.nn.relu(out + x_nchw)


if __name__ == "__main__":
    key = jax.random.PRNGKey(0)
    k_x, k_w1, k_w2 = jax.random.split(key, 3)

    # C * W = 128 -> fully lane-dense tiles; N=4 -> 2 parallel grid steps (v7x).
    N, C, H, W = 4, 8, 16, 16
    kernel_size, stride, padding = 3, 1, 1

    x = jax.random.normal(k_x, (N, C, H, W), dtype=jnp.float32)
    fan_in = kernel_size * kernel_size
    w1 = jax.random.normal(k_w1, (C, 1, kernel_size, kernel_size),
                           dtype=jnp.float32) / jnp.sqrt(fan_in)
    w2 = jax.random.normal(k_w2, (C, 1, kernel_size, kernel_size),
                           dtype=jnp.float32) / jnp.sqrt(fan_in)

    out = resblock_pallas(x, w1, w2, kernel_size=kernel_size,
                          stride=stride, padding=padding)
    out = jax.block_until_ready(out)

    ref = jax.block_until_ready(
        _reference_resblock(x, w1, w2, padding=padding))

    assert out.shape == (N, C, H, W)
    assert jnp.max(jnp.abs(out - ref)) < 1e-4, "mismatch vs reference"

    print("KERNEL_OK")
</pallas_src>

<mosaic_0001>
module attributes {stable_mosaic.version = 11 : i64} {
  func.func @_resblock_kernel(%arg0: i32, %arg1: memref<2x16x128xf32, #tpu.memory_space<vmem>>, %arg2: memref<3x3x128xf32, #tpu.memory_space<vmem>>, %arg3: memref<3x3x128xf32, #tpu.memory_space<vmem>>, %arg4: memref<2x16x128xf32, #tpu.memory_space<vmem>>, %arg5: memref<2x18x144xf32, #tpu.memory_space<vmem>>, %arg6: memref<2x18x144xf32, #tpu.memory_space<vmem>>) attributes {dimension_semantics = [#tpu.dimension_semantics<parallel>], iteration_bounds = array<i64: 2>, scalar_prefetch = 0 : i64, scratch_operands = 2 : i64, tpu.core_type = #tpu.core_type<tc>, window_params = [{transform_indices = @transform_0, window_bounds = array<i64: 2, 16, 128>}, {pipeline_mode = #tpu.pipeline_mode<synchronous>, transform_indices = @transform_1, window_bounds = array<i64: 3, 3, 128>}, {pipeline_mode = #tpu.pipeline_mode<synchronous>, transform_indices = @transform_2, window_bounds = array<i64: 3, 3, 128>}, {transform_indices = @transform_3, window_bounds = array<i64: 2, 16, 128>}]} {
    %c0 = arith.constant 0 : index
    %c0_0 = arith.constant 0 : index
    %c0_1 = arith.constant 0 : index
    %0 = vector.load %arg1[%c0, %c0_0, %c0_1] : memref<2x16x128xf32, #tpu.memory_space<vmem>>, vector<2x16x128xf32>
    %cst = arith.constant 0.000000e+00 : f32
    %1 = vector.broadcast %cst : f32 to vector<2x1x144xf32>
    %c0_2 = arith.constant 0 : index
    %c0_3 = arith.constant 0 : index
    %c0_4 = arith.constant 0 : index
    %2 = vector.load %arg5[%c0_2, %c0_3, %c0_4] : memref<2x18x144xf32, #tpu.memory_space<vmem>>, vector<2x1x144xf32>
    tpu.vector_store %arg5[%c0_2, %c0_3, %c0_4], %1 {strides = array<i32>} : memref<2x18x144xf32, #tpu.memory_space<vmem>>, vector<2x1x144xf32>,
    %c0_5 = arith.constant 0 : index
    %c17 = arith.constant 17 : index
    %c0_6 = arith.constant 0 : index
    %3 = vector.load %arg5[%c0_5, %c17, %c0_6] : memref<2x18x144xf32, #tpu.memory_space<vmem>>, vector<2x1x144xf32>
    tpu.vector_store %arg5[%c0_5, %c17, %c0_6], %1 {strides = array<i32>} : memref<2x18x144xf32, #tpu.memory_space<vmem>>, vector<2x1x144xf32>,
    %cst_7 = arith.constant 0.000000e+00 : f32
    %4 = vector.broadcast %cst_7 : f32 to vector<2x18x8xf32>
    %c0_8 = arith.constant 0 : index
    %c0_9 = arith.constant 0 : index
    %c0_10 = arith.constant 0 : index
    %5 = vector.load %arg5[%c0_8, %c0_9, %c0_10] : memref<2x18x144xf32, #tpu.memory_space<vmem>>, vector<2x18x8xf32>
    tpu.vector_store %arg5[%c0_8, %c0_9, %c0_10], %4 {strides = array<i32>} : memref<2x18x144xf32, #tpu.memory_space<vmem>>, vector<2x18x8xf32>,
    %c0_11 = arith.constant 0 : index
    %c0_12 = arith.constant 0 : index
    %c136 = arith.constant 136 : index
    %6 = vector.load %arg5[%c0_11, %c0_12, %c136] : memref<2x18x144xf32, #tpu.memory_space<vmem>>, vector<2x18x8xf32>
    tpu.vector_store %arg5[%c0_11, %c0_12, %c136], %4 {strides = array<i32>} : memref<2x18x144xf32, #tpu.memory_space<vmem>>, vector<2x18x8xf32>,
    %c0_13 = arith.constant 0 : index
    %c1 = arith.constant 1 : index
    %c8 = arith.constant 8 : index
    %7 = vector.load %arg5[%c0_13, %c1, %c8] : memref<2x18x144xf32, #tpu.memory_space<vmem>>, vector<2x16x128xf32>
    tpu.vector_store %arg5[%c0_13, %c1, %c8], %0 {strides = array<i32>} : memref<2x18x144xf32, #tpu.memory_space<vmem>>, vector<2x16x128xf32>,
    %c0_14 = arith.constant 0 : index
    %c0_15 = arith.constant 0 : index
    %c0_16 = arith.constant 0 : index
    %8 = vector.load %arg5[%c0_14, %c0_15, %c0_16] : memref<2x18x144xf32, #tpu.memory_space<vmem>>, vector<2x18x144xf32>
    %9 = vector.extract_strided_slice %8 {offsets = [0, 0, 0], sizes = [2, 18, 128], strides = [1, 1, 1]} : vector<2x18x144xf32> to vector<2x18x128xf32>
    %c0_17 = arith.constant 0 : index
    %c0_18 = arith.constant 0 : index
    %c0_19 = arith.constant 0 : index
    %10 = vector.load %arg2[%c0_17, %c0_18, %c0_19] : memref<3x3x128xf32, #tpu.memory_space<vmem>>, vector<1x1x128xf32>
    %11 = vector.shape_cast %10 : vector<1x1x128xf32> to vector<128xf32>
    %12 = vector.extract_strided_slice %9 {offsets = [0, 0, 0], sizes = [2, 16, 128], strides = [1, 1, 1]} : vector<2x18x128xf32> to vector<2x16x128xf32>
    %13 = vector.shape_cast %11 : vector<128xf32> to vector<1x1x128xf32>
    %14 = vector.broadcast %13 : vector<1x1x128xf32> to vector<2x16x128xf32>
    %15 = arith.mulf %14, %12 : vector<2x16x128xf32>
    %c1_20 = arith.constant 1 : index
    %c0_21 = arith.constant 0 : index
    %c0_22 = arith.constant 0 : index
    %16 = vector.load %arg2[%c1_20, %c0_21, %c0_22] : memref<3x3x128xf32, #tpu.memory_space<vmem>>, vector<1x1x128xf32>
    %17 = vector.shape_cast %16 : vector<1x1x128xf32> to vector<128xf32>
    %18 = vector.extract_strided_slice %9 {offsets = [0, 1, 0], sizes = [2, 16, 128], strides = [1, 1, 1]} : vector<2x18x128xf32> to vector<2x16x128xf32>
    %19 = vector.shape_cast %17 : vector<128xf32> to vector<1x1x128xf32>
    %20 = vector.broadcast %19 : vector<1x1x128xf32> to vector<2x16x128xf32>
    %21 = arith.mulf %20, %18 : vector<2x16x128xf32>
    %22 = arith.addf %15, %21 : vector<2x16x128xf32>
    %c2 = arith.constant 2 : index
    %c0_23 = arith.constant 0 : index
    %c0_24 = arith.constant 0 : index
    %23 = vector.load %arg2[%c2, %c0_23, %c0_24] : memref<3x3x128xf32, #tpu.memory_space<vmem>>, vector<1x1x128xf32>
    %24 = vector.shape_cast %23 : vector<1x1x128xf32> to vector<128xf32>
    %25 = vector.extract_strided_slice %9 {offsets = [0, 2, 0], sizes = [2, 16, 128], strides = [1, 1, 1]} : vector<2x18x128xf32> to vector<2x16x128xf32>
    %26 = vector.shape_cast %24 : vector<128xf32> to vector<1x1x128xf32>
    %27 = vector.broadcast %26 : vector<1x1x128xf32> to vector<2x16x128xf32>
    %28 = arith.mulf %27, %25 : vector<2x16x128xf32>
    %29 = arith.addf %22, %28 : vector<2x16x128xf32>
    %30 = vector.extract_strided_slice %8 {offsets = [0, 0, 8], sizes = [2, 18, 128], strides = [1, 1, 1]} : vector<2x18x144xf32> to vector<2x18x128xf32>
    %c0_25 = arith.constant 0 : index
    %c1_26 = arith.constant 1 : index
    %c0_27 = arith.constant 0 : index
    %31 = vector.load %arg2[%c0_25, %c1_26, %c0_27] : memref<3x3x128xf32, #tpu.memory_space<vmem>>, vector<1x1x128xf32>
    %32 = vector.shape_cast %31 : vector<1x1x128xf32> to vector<128xf32>
    %33 = vector.extract_strided_slice %30 {offsets = [0, 0, 0], sizes = [2, 16, 128], strides = [1, 1, 1]} : vector<2x18x128xf32> to vector<2x16x128xf32>
    %34 = vector.shape_cast %32 : vector<128xf32> to vector<1x1x128xf32>
    %35 = vector.broadcast %34 : vector<1x1x128xf32> to vector<2x16x128xf32>
    %36 = arith.mulf %35, %33 : vector<2x16x128xf32>
    %37 = arith.addf %29, %36 : vector<2x16x128xf32>
    %c1_28 = arith.constant 1 : index
    %c1_29 = arith.constant 1 : index
    %c0_30 = arith.constant 0 : index
    %38 = vector.load %arg2[%c1_28, %c1_29, %c0_30] : memref<3x3x128xf32, #tpu.memory_space<vmem>>, vector<1x1x128xf32>
    %39 = vector.shape_cast %38 : vector<1x1x128xf32> to vector<128xf32>
    %40 = vector.extract_strided_slice %30 {offsets = [0, 1, 0], sizes = [2, 16, 128], strides = [1, 1, 1]} : vector<2x18x128xf32> to vector<2x16x128xf32>
    %41 = vector.shape_cast %39 : vector<128xf32> to vector<1x1x128xf32>
    %42 = vector.broadcast %41 : vector<1x1x128xf32> to vector<2x16x128xf32>
    %43 = arith.mulf %42, %40 : vector<2x16x128xf32>
    %44 = arith.addf %37, %43 : vector<2x16x128xf32>
    %c2_31 = arith.constant 2 : index
    %c1_32 = arith.constant 1 : index
    %c0_33 = arith.constant 0 : index
    %45 = vector.load %arg2[%c2_31, %c1_32, %c0_33] : memref<3x3x128xf32, #tpu.memory_space<vmem>>, vector<1x1x128xf32>
    %46 = vector.shape_cast %45 : vector<1x1x128xf32> to vector<128xf32>
    %47 = vector.extract_strided_slice %30 {offsets = [0, 2, 0], sizes = [2, 16, 128], strides = [1, 1, 1]} : vector<2x18x128xf32> to vector<2x16x128xf32>
    %48 = vector.shape_cast %46 : vector<128xf32> to vector<1x1x128xf32>
    %49 = vector.broadcast %48 : vector<1x1x128xf32> to vector<2x16x128xf32>
    %50 = arith.mulf %49, %47 : vector<2x16x128xf32>
    %51 = arith.addf %44, %50 : vector<2x16x128xf32>
    %52 = vector.extract_strided_slice %8 {offsets = [0, 0, 16], sizes = [2, 18, 128], strides = [1, 1, 1]} : vector<2x18x144xf32> to vector<2x18x128xf32>
    %c0_34 = arith.constant 0 : index
    %c2_35 = arith.constant 2 : index
    %c0_36 = arith.constant 0 : index
    %53 = vector.load %arg2[%c0_34, %c2_35, %c0_36] : memref<3x3x128xf32, #tpu.memory_space<vmem>>, vector<1x1x128xf32>
    %54 = vector.shape_cast %53 : vector<1x1x128xf32> to vector<128xf32>
    %55 = vector.extract_strided_slice %52 {offsets = [0, 0, 0], sizes = [2, 16, 128], strides = [1, 1, 1]} : vector<2x18x128xf32> to vector<2x16x128xf32>
    %56 = vector.shape_cast %54 : vector<128xf32> to vector<1x1x128xf32>
    %57 = vector.broadcast %56 : vector<1x1x128xf32> to vector<2x16x128xf32>
    %58 = arith.mulf %57, %55 : vector<2x16x128xf32>
    %59 = arith.addf %51, %58 : vector<2x16x128xf32>
    %c1_37 = arith.constant 1 : index
    %c2_38 = arith.constant 2 : index
    %c0_39 = arith.constant 0 : index
    %60 = vector.load %arg2[%c1_37, %c2_38, %c0_39] : memref<3x3x128xf32, #tpu.memory_space<vmem>>, vector<1x1x128xf32>
    %61 = vector.shape_cast %60 : vector<1x1x128xf32> to vector<128xf32>
    %62 = vector.extract_strided_slice %52 {offsets = [0, 1, 0], sizes = [2, 16, 128], strides = [1, 1, 1]} : vector<2x18x128xf32> to vector<2x16x128xf32>
    %63 = vector.shape_cast %61 : vector<128xf32> to vector<1x1x128xf32>
    %64 = vector.broadcast %63 : vector<1x1x128xf32> to vector<2x16x128xf32>
    %65 = arith.mulf %64, %62 : vector<2x16x128xf32>
    %66 = arith.addf %59, %65 : vector<2x16x128xf32>
    %c2_40 = arith.constant 2 : index
    %c2_41 = arith.constant 2 : index
    %c0_42 = arith.constant 0 : index
    %67 = vector.load %arg2[%c2_40, %c2_41, %c0_42] : memref<3x3x128xf32, #tpu.memory_space<vmem>>, vector<1x1x128xf32>
    %68 = vector.shape_cast %67 : vector<1x1x128xf32> to vector<128xf32>
    %69 = vector.extract_strided_slice %52 {offsets = [0, 2, 0], sizes = [2, 16, 128], strides = [1, 1, 1]} : vector<2x18x128xf32> to vector<2x16x128xf32>
    %70 = vector.shape_cast %68 : vector<128xf32> to vector<1x1x128xf32>
    %71 = vector.broadcast %70 : vector<1x1x128xf32> to vector<2x16x128xf32>
    %72 = arith.mulf %71, %69 : vector<2x16x128xf32>
    %73 = arith.addf %66, %72 : vector<2x16x128xf32>
    %cst_43 = arith.constant 0.000000e+00 : f32
    %74 = vector.broadcast %cst_43 : f32 to vector<2x16x128xf32>
    %75 = arith.maximumf %73, %74 : vector<2x16x128xf32>
    %cst_44 = arith.constant 0.000000e+00 : f32
    %76 = vector.broadcast %cst_44 : f32 to vector<2x1x144xf32>
    %c0_45 = arith.constant 0 : index
    %c0_46 = arith.constant 0 : index
    %c0_47 = arith.constant 0 : index
    %77 = vector.load %arg6[%c0_45, %c0_46, %c0_47] : memref<2x18x144xf32, #tpu.memory_space<vmem>>, vector<2x1x144xf32>
    tpu.vector_store %arg6[%c0_45, %c0_46, %c0_47], %76 {strides = array<i32>} : memref<2x18x144xf32, #tpu.memory_space<vmem>>, vector<2x1x144xf32>,
    %c0_48 = arith.constant 0 : index
    %c17_49 = arith.constant 17 : index
    %c0_50 = arith.constant 0 : index
    %78 = vector.load %arg6[%c0_48, %c17_49, %c0_50] : memref<2x18x144xf32, #tpu.memory_space<vmem>>, vector<2x1x144xf32>
    tpu.vector_store %arg6[%c0_48, %c17_49, %c0_50], %76 {strides = array<i32>} : memref<2x18x144xf32, #tpu.memory_space<vmem>>, vector<2x1x144xf32>,
    %cst_51 = arith.constant 0.000000e+00 : f32
    %79 = vector.broadcast %cst_51 : f32 to vector<2x18x8xf32>
    %c0_52 = arith.constant 0 : index
    %c0_53 = arith.constant 0 : index
    %c0_54 = arith.constant 0 : index
    %80 = vector.load %arg6[%c0_52, %c0_53, %c0_54] : memref<2x18x144xf32, #tpu.memory_space<vmem>>, vector<2x18x8xf32>
    tpu.vector_store %arg6[%c0_52, %c0_53, %c0_54], %79 {strides = array<i32>} : memref<2x18x144xf32, #tpu.memory_space<vmem>>, vector<2x18x8xf32>,
    %c0_55 = arith.constant 0 : index
    %c0_56 = arith.constant 0 : index
    %c136_57 = arith.constant 136 : index
    %81 = vector.load %arg6[%c0_55, %c0_56, %c136_57] : memref<2x18x144xf32, #tpu.memory_space<vmem>>, vector<2x18x8xf32>
    tpu.vector_store %arg6[%c0_55, %c0_56, %c136_57], %79 {strides = array<i32>} : memref<2x18x144xf32, #tpu.memory_space<vmem>>, vector<2x18x8xf32>,
    %c0_58 = arith.constant 0 : index
    %c1_59 = arith.constant 1 : index
    %c8_60 = arith.constant 8 : index
    %82 = vector.load %arg6[%c0_58, %c1_59, %c8_60] : memref<2x18x144xf32, #tpu.memory_space<vmem>>, vector<2x16x128xf32>
    tpu.vector_store %arg6[%c0_58, %c1_59, %c8_60], %75 {strides = array<i32>} : memref<2x18x144xf32, #tpu.memory_space<vmem>>, vector<2x16x128xf32>,
    %c0_61 = arith.constant 0 : index
    %c0_62 = arith.constant 0 : index
    %c0_63 = arith.constant 0 : index
    %83 = vector.load %arg6[%c0_61, %c0_62, %c0_63] : memref<2x18x144xf32, #tpu.memory_space<vmem>>, vector<2x18x144xf32>
    %84 = vector.extract_strided_slice %83 {offsets = [0, 0, 0], sizes = [2, 18, 128], strides = [1, 1, 1]} : vector<2x18x144xf32> to vector<2x18x128xf32>
    %c0_64 = arith.constant 0 : index
    %c0_65 = arith.constant 0 : index
    %c0_66 = arith.constant 0 : index
    %85 = vector.load %arg3[%c0_64, %c0_65, %c0_66] : memref<3x3x128xf32, #tpu.memory_space<vmem>>, vector<1x1x128xf32>
    %86 = vector.shape_cast %85 : vector<1x1x128xf32> to vector<128xf32>
    %87 = vector.extract_strided_slice %84 {offsets = [0, 0, 0], sizes = [2, 16, 128], strides = [1, 1, 1]} : vector<2x18x128xf32> to vector<2x16x128xf32>
    %88 = vector.shape_cast %86 : vector<128xf32> to vector<1x1x128xf32>
    %89 = vector.broadcast %88 : vector<1x1x128xf32> to vector<2x16x128xf32>
    %90 = arith.mulf %89, %87 : vector<2x16x128xf32>
    %c1_67 = arith.constant 1 : index
    %c0_68 = arith.constant 0 : index
    %c0_69 = arith.constant 0 : index
    %91 = vector.load %arg3[%c1_67, %c0_68, %c0_69] : memref<3x3x128xf32, #tpu.memory_space<vmem>>, vector<1x1x128xf32>
    %92 = vector.shape_cast %91 : vector<1x1x128xf32> to vector<128xf32>
    %93 = vector.extract_strided_slice %84 {offsets = [0, 1, 0], sizes = [2, 16, 128], strides = [1, 1, 1]} : vector<2x18x128xf32> to vector<2x16x128xf32>
    %94 = vector.shape_cast %92 : vector<128xf32> to vector<1x1x128xf32>
    %95 = vector.broadcast %94 : vector<1x1x128xf32> to vector<2x16x128xf32>
    %96 = arith.mulf %95, %93 : vector<2x16x128xf32>
    %97 = arith.addf %90, %96 : vector<2x16x128xf32>
    %c2_70 = arith.constant 2 : index
    %c0_71 = arith.constant 0 : index
    %c0_72 = arith.constant 0 : index
    %98 = vector.load %arg3[%c2_70, %c0_71, %c0_72] : memref<3x3x128xf32, #tpu.memory_space<vmem>>, vector<1x1x128xf32>
    %99 = vector.shape_cast %98 : vector<1x1x128xf32> to vector<128xf32>
    %100 = vector.extract_strided_slice %84 {offsets = [0, 2, 0], sizes = [2, 16, 128], strides = [1, 1, 1]} : vector<2x18x128xf32> to vector<2x16x128xf32>
    %101 = vector.shape_cast %99 : vector<128xf32> to vector<1x1x128xf32>
    %102 = vector.broadcast %101 : vector<1x1x128xf32> to vector<2x16x128xf32>
    %103 = arith.mulf %102, %100 : vector<2x16x128xf32>
    %104 = arith.addf %97, %103 : vector<2x16x128xf32>
    %105 = vector.extract_strided_slice %83 {offsets = [0, 0, 8], sizes = [2, 18, 128], strides = [1, 1, 1]} : vector<2x18x144xf32> to vector<2x18x128xf32>
    %c0_73 = arith.constant 0 : index
    %c1_74 = arith.constant 1 : index
    %c0_75 = arith.constant 0 : index
    %106 = vector.load %arg3[%c0_73, %c1_74, %c0_75] : memref<3x3x128xf32, #tpu.memory_space<vmem>>, vector<1x1x128xf32>
    %107 = vector.shape_cast %106 : vector<1x1x128xf32> to vector<128xf32>
    %108 = vector.extract_strided_slice %105 {offsets = [0, 0, 0], sizes = [2, 16, 128], strides = [1, 1, 1]} : vector<2x18x128xf32> to vector<2x16x128xf32>
    %109 = vector.shape_cast %107 : vector<128xf32> to vector<1x1x128xf32>
    %110 = vector.broadcast %109 : vector<1x1x128xf32> to vector<2x16x128xf32>
    %111 = arith.mulf %110, %108 : vector<2x16x128xf32>
    %112 = arith.addf %104, %111 : vector<2x16x128xf32>
    %c1_76 = arith.constant 1 : index
    %c1_77 = arith.constant 1 : index
    %c0_78 = arith.constant 0 : index
    %113 = vector.load %arg3[%c1_76, %c1_77, %c0_78] : memref<3x3x128xf32, #tpu.memory_space<vmem>>, vector<1x1x128xf32>
    %114 = vector.shape_cast %113 : vector<1x1x128xf32> to vector<128xf32>
    %115 = vector.extract_strided_slice %105 {offsets = [0, 1, 0], sizes = [2, 16, 128], strides = [1, 1, 1]} : vector<2x18x128xf32> to vector<2x16x128xf32>
    %116 = vector.shape_cast %114 : vector<128xf32> to vector<1x1x128xf32>
    %117 = vector.broadcast %116 : vector<1x1x128xf32> to vector<2x16x128xf32>
    %118 = arith.mulf %117, %115 : vector<2x16x128xf32>
    %119 = arith.addf %112, %118 : vector<2x16x128xf32>
    %c2_79 = arith.constant 2 : index
    %c1_80 = arith.constant 1 : index
    %c0_81 = arith.constant 0 : index
    %120 = vector.load %arg3[%c2_79, %c1_80, %c0_81] : memref<3x3x128xf32, #tpu.memory_space<vmem>>, vector<1x1x128xf32>
    %121 = vector.shape_cast %120 : vector<1x1x128xf32> to vector<128xf32>
    %122 = vector.extract_strided_slice %105 {offsets = [0, 2, 0], sizes = [2, 16, 128], strides = [1, 1, 1]} : vector<2x18x128xf32> to vector<2x16x128xf32>
    %123 = vector.shape_cast %121 : vector<128xf32> to vector<1x1x128xf32>
    %124 = vector.broadcast %123 : vector<1x1x128xf32> to vector<2x16x128xf32>
    %125 = arith.mulf %124, %122 : vector<2x16x128xf32>
    %126 = arith.addf %119, %125 : vector<2x16x128xf32>
    %127 = vector.extract_strided_slice %83 {offsets = [0, 0, 16], sizes = [2, 18, 128], strides = [1, 1, 1]} : vector<2x18x144xf32> to vector<2x18x128xf32>
    %c0_82 = arith.constant 0 : index
    %c2_83 = arith.constant 2 : index
    %c0_84 = arith.constant 0 : index
    %128 = vector.load %arg3[%c0_82, %c2_83, %c0_84] : memref<3x3x128xf32, #tpu.memory_space<vmem>>, vector<1x1x128xf32>
    %129 = vector.shape_cast %128 : vector<1x1x128xf32> to vector<128xf32>
    %130 = vector.extract_strided_slice %127 {offsets = [0, 0, 0], sizes = [2, 16, 128], strides = [1, 1, 1]} : vector<2x18x128xf32> to vector<2x16x128xf32>
    %131 = vector.shape_cast %129 : vector<128xf32> to vector<1x1x128xf32>
    %132 = vector.broadcast %131 : vector<1x1x128xf32> to vector<2x16x128xf32>
    %133 = arith.mulf %132, %130 : vector<2x16x128xf32>
    %134 = arith.addf %126, %133 : vector<2x16x128xf32>
    %c1_85 = arith.constant 1 : index
    %c2_86 = arith.constant 2 : index
    %c0_87 = arith.constant 0 : index
    %135 = vector.load %arg3[%c1_85, %c2_86, %c0_87] : memref<3x3x128xf32, #tpu.memory_space<vmem>>, vector<1x1x128xf32>
    %136 = vector.shape_cast %135 : vector<1x1x128xf32> to vector<128xf32>
    %137 = vector.extract_strided_slice %127 {offsets = [0, 1, 0], sizes = [2, 16, 128], strides = [1, 1, 1]} : vector<2x18x128xf32> to vector<2x16x128xf32>
    %138 = vector.shape_cast %136 : vector<128xf32> to vector<1x1x128xf32>
    %139 = vector.broadcast %138 : vector<1x1x128xf32> to vector<2x16x128xf32>
    %140 = arith.mulf %139, %137 : vector<2x16x128xf32>
    %141 = arith.addf %134, %140 : vector<2x16x128xf32>
    %c2_88 = arith.constant 2 : index
    %c2_89 = arith.constant 2 : index
    %c0_90 = arith.constant 0 : index
    %142 = vector.load %arg3[%c2_88, %c2_89, %c0_90] : memref<3x3x128xf32, #tpu.memory_space<vmem>>, vector<1x1x128xf32>
    %143 = vector.shape_cast %142 : vector<1x1x128xf32> to vector<128xf32>
    %144 = vector.extract_strided_slice %127 {offsets = [0, 2, 0], sizes = [2, 16, 128], strides = [1, 1, 1]} : vector<2x18x128xf32> to vector<2x16x128xf32>
    %145 = vector.shape_cast %143 : vector<128xf32> to vector<1x1x128xf32>
    %146 = vector.broadcast %145 : vector<1x1x128xf32> to vector<2x16x128xf32>
    %147 = arith.mulf %146, %144 : vector<2x16x128xf32>
    %148 = arith.addf %141, %147 : vector<2x16x128xf32>
    %149 = arith.addf %148, %0 : vector<2x16x128xf32>
    %cst_91 = arith.constant 0.000000e+00 : f32
    %150 = vector.broadcast %cst_91 : f32 to vector<2x16x128xf32>
    %151 = arith.maximumf %149, %150 : vector<2x16x128xf32>
    %c0_92 = arith.constant 0 : index
    %c0_93 = arith.constant 0 : index
    %c0_94 = arith.constant 0 : index
    %152 = vector.load %arg4[%c0_92, %c0_93, %c0_94] : memref<2x16x128xf32, #tpu.memory_space<vmem>>, vector<2x16x128xf32>
    tpu.vector_store %arg4[%c0_92, %c0_93, %c0_94], %151 {strides = array<i32>} : memref<2x16x128xf32, #tpu.memory_space<vmem>>, vector<2x16x128xf32>,
    return
  }
  func.func @transform_0(%arg0: i32) -> (i32, i32, i32) {
    %c0_i32 = arith.constant 0 : i32
    %c0_i32_0 = arith.constant 0 : i32
    %c0_i32_1 = arith.constant 0 : i32
    return %arg0, %c0_i32, %c0_i32_0 : i32, i32, i32
  }
  func.func @transform_1(%arg0: i32) -> (i32, i32, i32) {
    %c0_i32 = arith.constant 0 : i32
    %c0_i32_0 = arith.constant 0 : i32
    %c0_i32_1 = arith.constant 0 : i32
    %c0_i32_2 = arith.constant 0 : i32
    return %c0_i32, %c0_i32_0, %c0_i32_1 : i32, i32, i32
  }
  func.func @transform_2(%arg0: i32) -> (i32, i32, i32) {
    %c0_i32 = arith.constant 0 : i32
    %c0_i32_0 = arith.constant 0 : i32
    %c0_i32_1 = arith.constant 0 : i32
    %c0_i32_2 = arith.constant 0 : i32
    return %c0_i32, %c0_i32_0, %c0_i32_1 : i32, i32, i32
  }
  func.func @transform_3(%arg0: i32) -> (i32, i32, i32) {
    %c0_i32 = arith.constant 0 : i32
    %c0_i32_0 = arith.constant 0 : i32
    %c0_i32_1 = arith.constant 0 : i32
    return %arg0, %c0_i32, %c0_i32_0 : i32, i32, i32
  }
}

</mosaic_0001>

<bundles_post_ra>
// kernel: tpu_custom_call.1
= control target key start
LH: loop header
LB: loop body
LE: loop exit
PB: predicated region body
PF: predicated region fallthrough
CT: control target
= control target key end

     0   :  { %8 = vsyncpa [#allocation5], 0  ;;  %s2206_s0 = inlined_call_operand.hbm [shape: f32[4,16,128], index: 0, kind: input, shape index: {}]   ;;  %s2207_s1 = inlined_call_operand.hbm [shape: f32[3,3,128], index: 1, kind: input, shape index: {}]   ;;  %s2208_s2 = inlined_call_operand.hbm [shape: f32[3,3,128], index: 2, kind: input, shape index: {}]   ;;  %s2209_s3 = inlined_call_operand.hbm [shape: f32[4,16,128], index: 3, kind: output, shape index: {}]  }
   0x1   :  { %10 = vsyncpa [#allocation5 + $0x1], 0 }
   0x2   :  { %11 = vsyncpa [#allocation8], 0 }
   0x3   :  { %12 = vsyncpa [#allocation6], 0 }
   0x4   :  { %14 = vsyncpa [#allocation6 + $0x1], 0  ;;  %s1531_s12 = smov 0   ;;  %s1533_s13 = smov 0  }
   0x5   :  { %s1535_s14 = smov 0   ;;  %s1537_s15 = smov 0  }
   0x6 LB: > { %s1552_s16 = sadd.s32 4294967295, %s1496_s15   ;;  %s1226_s17 = sadd.s32 4294967294, %s1496_s15   ;;  %s1496_s15 = sphi %s1537_s15, %s2231_s15   ;;  %s1492_s14 = sphi %s1535_s14, %s2230_s14   ;;  %s1488_s13 = sphi %s1533_s13, %s2229_s13   ;;  %s1484_s12 = sphi %s1531_s12, %s2228_s12  }
   0x7   : > { %p40_p0 = scmp.ne.s32.totalorder %s1488_s13, %s1484_s12  ;;  %p2210_p1 = scmp.eq.s32.totalorder %s1552_s16, 0 }
   0x8   : > { %p112_p3 = scmp.eq.s32.totalorder %s1226_s17, 1  ;;  %p1227_p5 = scmp.ge.s32.totalorder %s1496_s15, 1 }
   0x9   : > { %p1561_p4 = por %p2210_p1, %p40_p0  ;;  %p119_p7 = scmp.lt.s32.totalorder %s1496_s15, 3 }
   0xa   : > { %p1566_p6 = por %p112_p3, %p40_p0  ;;  %s1498_s21 = smov [#allocation7]  }
   0xb   : > { %s2214_s18 = scalar_select %p1561_p4, 1, 0 }
   0xc   : > { %s2215_s19 = scalar_select %p1566_p6, 1, 0 }
   0xd   : > { %p1571_p8 = pnand %p1227_p5, %p119_p7  ;;  %s131_s22 = sshll.u32 %s1498_s21, 4  ;;  %s132_s22 = int_to_ptr.vmem [resolvable:$true] %s131_s22 }
   0xe   : > { %s1499_s24 = smov [#allocation9]   ;;  %s1359_s26 = scalar_lea.vmem %s132_s22, 192 }
   0xf   : > { %s2216_s20 = scalar_select %p1571_p8, 1, 0 }
  0x10   : > { %p1280_p9 = pneg %p1571_p8  ;;  %s144_s25 = sshll.u32 %s1499_s24, 4  ;;  %s145_s25 = int_to_ptr.vmem [resolvable:$true] %s144_s25 }
  0x11   : > { %p1360_p13 = scmp.ne.s32.totalorder %s132_s22, %s1359_s26  ;;  %p1367_p5 = scmp.lt.s32.totalorder %s132_s22, %s132_s22 }
  0x12   : > { %p1580_p11 = pnand %p1280_p9, %p2210_p1  ;;  %p1368_p7 = scmp.lt.s32.totalorder %s1359_s26, %s1359_s26 }
  0x14   : > { %p1350_p12 = pneg %p1580_p11  ;;  %p1369_p10 = por %p1368_p7, %p1367_p5 }
  0x16   : > { %p1362_p0 = pnand %p1360_p13, %p1350_p12 }
  0x18   : > { %p1363_p3 = pneg %p1362_p0 }
  0x1a   : > { %p1370_p9 = pnand %p1369_p10, %p1363_p3 }
  0x1c   : > { %1373 = shalt.err (!%p1370_p9)
}
  0x1d   : > { %s1500_s27 = smov 64   ;;  %s1501_s28 = smov 4  }
  0x1e   : > { %1283 = dma.hbm_to_vmem [thread:$0]  (!%p1580_p11), %s2207_s1, 192, %s132_s22, [#allocation8], %s1500_s27, %s1500_s27, %s1501_s28  }
  0x1f   : > { %s1385_s4 = scalar_lea.vmem %s145_s25, 192  ;;  %p1393_p2 = scmp.lt.s32.totalorder %s145_s25, %s145_s25 }
  0x20   : > { %p1386_p1 = scmp.ne.s32.totalorder %s145_s25, %s1385_s4  ;;  %p1394_p6 = scmp.lt.s32.totalorder %s1385_s4, %s1385_s4 }
  0x22   : > { %p1388_p13 = pnand %p1386_p1, %p1350_p12  ;;  %p1395_p5 = por %p1394_p6, %p1393_p2 }
  0x24   : > { %p1389_p0 = pneg %p1388_p13 }
  0x26   : > { %p1396_p10 = pnand %p1395_p5, %p1389_p0 }
  0x28   : > { %1399 = shalt.err (!%p1396_p10)
}
  0x29   : > { %1286 = dma.hbm_to_vmem [thread:$0]  (!%p1580_p11), %s2208_s2, 192, %s145_s25, [#allocation8], %s1500_s27, %s1500_s27, %s1501_s28  }
  0x2a   : > { %s1603_s7 = sadd.s32 1, %s1496_s15   ;;  %s27_s8 = sadd.s32 1, %s1492_s14 }
  0x2b   : > { %s24_s9 = ssub.s32 %s1496_s15, %s1603_s7  ;;  %p34_p1 = scmp.ne.s32.totalorder %s1492_s14, %s1488_s13 }
  0x2c   : > { %p25_p2 = scmp.eq.s32.totalorder %s24_s9, 0  ;;  %p35_p6 = scmp.eq.s32.totalorder %s1496_s15, 0 }
  0x2d   : > { %p2218_p12 = scmp.eq.s32.totalorder %s1552_s16, 1  ;;  %p1297_p7 = scmp.lt.s32.totalorder %s1496_s15, 2 }
  0x2e   : > { %s1619_s11 = scalar_select %p25_p2, %s1492_s14, %s27_s8  }
  0x2f   : > { %p1613_p3 = por %p2218_p12, %p34_p1  ;;  %p36_p9 = por %p35_p6, %p34_p1 }
  0x30   : > { %s158_s17 = sand.u32 1, %s1492_s14   ;;  %s1265_s22 = sshll.u32 %s1496_s15, 9 }
  0x31   : > { %s2219_s10 = scalar_select %p1613_p3, 1, 0 }
  0x32   : > { %s1231_s21 = sshll.u32 %s158_s17, 5  ;;  %s1626_s25 = scalar_lea.hbm %s2206_s0, %s1265_s22 }
  0x33   : > { %s162_s26 = scalar_lea.vmem [#allocation4], %s1231_s21  ;;  %p1630_p11 = pnand %p1297_p7, %p36_p9 }
  0x34   : > { %s170_s27 = sshll.u32 %s162_s26, 4  ;;  %s1634_s29 = scalar_lea.sflag [#allocation5], %s158_s17  ;;  %s1628_s27 = int_to_ptr.vmem [resolvable:$true] %s170_s27 }
  0x35   : > { %s1400_s30 = scalar_lea.hbm %s1626_s25, 512  ;;  %p1402_p0 = pneg %p1630_p11 }
  0x36   : > { %p1401_p13 = scmp.ne.s32.totalorder %s1626_s25, %s1400_s30  ;;  %s1405_s6 = scalar_lea.hbm %s2206_s0, 1024 }
  0x37   : > { %p1406_p1 = scmp.lt.s32.totalorder %s1626_s25, %s2206_s0  ;;  %p1407_p2 = scmp.lt.s32.totalorder %s1405_s6, %s1400_s30 }
  0x38   : > { %p1403_p5 = pnand %p1402_p0, %p1401_p13 }
  0x39   : > { %p1408_p6 = por %p1407_p2, %p1406_p1 }
  0x3a   : > { %p1404_p10 = pneg %p1403_p5 }
  0x3c   : > { %p1409_p12 = pnand %p1408_p6, %p1404_p10 }
  0x3e   : > { %1412 = shalt.err (!%p1409_p12)
}
  0x3f   : > { %s1413_s17 = scalar_lea.vmem %s1628_s27, 512  ;;  %s1502_s21 = smov [#allocation4]  }
  0x40   : > { %p1414_p7 = scmp.ne.s32.totalorder %s1628_s27, %s1413_s17  ;;  %s1418_s22 = sshll.u32 %s1502_s21, 4  ;;  %s1419_s22 = int_to_ptr.vmem [resolvable:$false] %s1418_s22 }
  0x41   : > { %s1420_s23 = scalar_lea.vmem %s1419_s22, 1024  ;;  %p1421_p5 = scmp.lt.s32.totalorder %s1628_s27, %s1419_s22 }
  0x42   : > { %p1416_p9 = pnand %p1414_p7, %p1402_p0  ;;  %p1422_p3 = scmp.lt.s32.totalorder %s1420_s23, %s1413_s17 }
  0x44   : > { %p1417_p13 = pneg %p1416_p9  ;;  %p1423_p4 = por %p1422_p3, %p1421_p5 }
  0x46   : > { %p1424_p8 = pnand %p1423_p4, %p1417_p13 }
  0x48   : > { %1427 = shalt.err (!%p1424_p8)
}
  0x49   : > { %s1503_s24 = smov 128   ;;  %s1504_s26 = smov 8  }
  0x4a   : > { %1290 = dma.hbm_to_vmem [thread:$0]  (!%p1630_p11), %s1626_s25, 512, %s1628_s27, %s1634_s29, %s1503_s24, %s1503_s24, %s1504_s26  }
  0x4b   : > { %p2221_p0 = scmp.ne.s32.totalorder %s2216_s20, 0 }
  0x4c   : > { %s1658_s30 = sand.u32 (!%p2221_p0), 1, %s1488_s13   ;;  %p2222_p4 = scmp.ne.s32.totalorder (!%p2221_p0), %s2214_s18, 0 }
  0x4d   : > { %182 = sbr.rel (%p2221_p0) target bundleno = 777 (0x309), region = 32  ;;  %s1236_s4 = sshll.u32 (!%p2221_p0), %s1658_s30, 5 }
  0x4e   : > { %s185_s5 = scalar_lea.sflag (!%p2221_p0), [#allocation5], %s1658_s30  ;;  %s1664_s6 = scalar_lea.vmem (!%p2221_p0), [#allocation4], %s1236_s4 }
  0x52   : > { %1471 = dma.done.wait (%p2222_p4), %s185_s5, 512  }
  0x53   : > { %1473 = vsyncadd (%p2222_p4), %s185_s5, 4294966784  ;;  %p2223_p8 = scmp.eq.s32.totalorder %s1552_s16, 0 }
  0x55   : > { %1475 = dma.done.wait (%p2223_p8), [#allocation8], 384   ;;  %p2224_p3 = pmov %p2223_p8 }
  0x56   : > { %v225_v0 = vlaneseq  ;;  %vm243_vm0 = vcmask 58368   ;;  %vm251_vm1 = vcmask 123968   ;;  %vm240_vm2 = vcmask 64512   ;;  %v222_v2 = vld [vmem:[%s1664_s6 + $0x8] sm:$0xff]  ;;  %v221_v3 = vld [vmem:[%s1664_s6] sm:$0xff]  ;;  %v223_v4 = vld [vmem:[%s1664_s6 + $0x10] sm:$0xff] }
  0x57   : > { %1477 = vsyncadd (%p2224_p3), [#allocation8], 4294966912  ;;  %vm248_vm4 = vcmask 130112   ;;  %v1505_v1 = vmov 0.0   ;;  %v262_v5 = vrot.slane %v222_v2, 7  ;;  %v261_v6 = vrot.slane %v221_v3, 7 }
  0x58   : > { %vm227_vm3 = vcmp.lt.s32.totalorder %v225_v0, 144  ;;  %242 = vst.msk [vmem:[#allocation2 + $0x10] sm:$0xff] %vm240_vm2, %v1505_v1  ;;  %246 = vst.msk [vmem:[#allocation2 + $0x40] sm:$0xff] %vm240_vm2, %v1505_v1  ;;  %vm260_vm5 = vcmask 1040384   ;;  %v224_v7 = vld [vmem:[%s1664_s6 + $0x18] sm:$0xff]  ;;  %s1506_s18 = smov 8  }
  0x59   : > { %689 = vst.msk [vmem:[#allocation3 + $0x10] sm:$0xff] %vm240_vm2, %v1505_v1  ;;  %692 = vst.msk [vmem:[#allocation3 + $0x40] sm:$0xff] %vm240_vm2, %v1505_v1  ;;  %271 = vrot.lane.b32.xlu1 %v262_v5, %s1506_s18  ;;  %267 = vrot.lane.b32.xlu0 %v261_v6, %s1506_s18  ;;  %v264_v8 = vrot.slane %v223_v4, 7  ;;  %v263_v9 = vsel %vm260_vm5, %v261_v6, %v262_v5  ;;  %v265_v10 = vrot.slane %v224_v7, 7  ;;  %vm292_vm6 = vcmask 1040448   ;;  %s1507_s20 = smov 120  }
  0x5a   : > { %235 = vst.msk [vmem:[#allocation2 + $0x21] ss:$8 sm:$0x3] %vm227_vm3, %v1505_v1  ;;  %229 = vst.msk [vmem:[#allocation2] ss:$8 sm:$0x3] %vm227_vm3, %v1505_v1 }
  0x5b   : > { %232 = vst.msk [vmem:[#allocation2 + $0x30] ss:$8 sm:$0x3] %vm227_vm3, %v1505_v1  ;;  %238 = vst.msk [vmem:[#allocation2 + $0x51] ss:$8 sm:$0x3] %vm227_vm3, %v1505_v1  ;;  %v266_v11 = vsel %vm260_vm5, %v264_v8, %v265_v10 }
  0x5c   : > { %677 = vst.msk [vmem:[#allocation3] ss:$8 sm:$0x3] %vm227_vm3, %v1505_v1  ;;  %680 = vst.msk [vmem:[#allocation3 + $0x30] ss:$8 sm:$0x3] %vm227_vm3, %v1505_v1 }
  0x5d   : > { %683 = vst.msk [vmem:[#allocation3 + $0x21] ss:$8 sm:$0x3] %vm227_vm3, %v1505_v1  ;;  %686 = vst.msk [vmem:[#allocation3 + $0x51] ss:$8 sm:$0x3] %vm227_vm3, %v1505_v1  ;;  %273 = vrot.lane.b32.xlu1 %v264_v8, %s1506_s18  ;;  %269 = vrot.lane.b32.xlu0 %v263_v9, %s1506_s18 }
  0x5e   : > { %250 = vst.msk [vmem:[#allocation2 + $0x18] sm:$0xff] %vm248_vm4, %v1505_v1  ;;  %254 = vst.msk [vmem:[#allocation2 + $0x48] sm:$0xff] %vm248_vm4, %v1505_v1  ;;  %vm294_vm7 = vcmask 57344   ;;  %vm285_vm8 = vcmask 1047617   ;;  %vm287_vm9 = vcmask 64513   ;;  %vm289_vm10 = vcmask 1047616  }
  0x5f   : > { %695 = vst.msk [vmem:[#allocation3 + $0x18] sm:$0xff] %vm248_vm4, %v1505_v1  ;;  %698 = vst.msk [vmem:[#allocation3 + $0x48] sm:$0xff] %vm248_vm4, %v1505_v1  ;;  %v1241_v23 = vld [vmem:[#allocation7 + $0x4] ss:$0 sm:$0xff]  ;;  %v1242_v24 = vld [vmem:[#allocation7 + $0x8] ss:$0 sm:$0xff] }
  0x60   : > { %244 = vst.msk [vmem:[#allocation2 + $0x20] sm:$0x3] %vm243_vm0, %v1505_v1  ;;  %247 = vst.msk [vmem:[#allocation2 + $0x50] sm:$0x3] %vm243_vm0, %v1505_v1  ;;  %s1508_s25 = smov 112   ;;  %vm341_vm11 = vcmask 1046528  }
  0x61   : > { %252 = vst.msk [vmem:[#allocation2 + $0x28] sm:$0x3] %vm251_vm1, %v1505_v1  ;;  %255 = vst.msk [vmem:[#allocation2 + $0x58] sm:$0x3] %vm251_vm1, %v1505_v1  ;;  %275 = vrot.lane.b32.xlu0 %v266_v11, %s1506_s18  ;;  %277 = vrot.lane.b32.xlu1 %v265_v10, %s1506_s18  ;;  %v1240_v26 = vld [vmem:[#allocation7] ss:$0 sm:$0xff] }
  0x62   : > { %241 = vst.msk [vmem:[#allocation2] sm:$0xff] %vm240_vm2, %v1505_v1  ;;  %245 = vst.msk [vmem:[#allocation2 + $0x30] sm:$0xff] %vm240_vm2, %v1505_v1  ;;  %vm378_vm12 = vcmask 1045504   ;;  %vm582_vm13 = vcmask 916480   ;;  %vm426_vm14 = vcmask 982016   ;;  %s218_s27 = scalar_lea.vmem [#allocation10], %s1236_s4 }
  0x63   : > { %249 = vst.msk [vmem:[#allocation2 + $0x8] sm:$0xff] %vm248_vm4, %v1505_v1  ;;  %253 = vst.msk [vmem:[#allocation2 + $0x38] sm:$0xff] %vm248_vm4, %v1505_v1  ;;  %s1267_s28 = sshll.u32 %s1552_s16, 9  ;;  %s1134_s29 = sshll.u32 %s218_s27, 4  ;;  %s2162_s29 = int_to_ptr.vmem [resolvable:$true] %s1134_s29 }
  0x64   : > { %688 = vst.msk [vmem:[#allocation3] sm:$0xff] %vm240_vm2, %v1505_v1  ;;  %691 = vst.msk [vmem:[#allocation3 + $0x30] sm:$0xff] %vm240_vm2, %v1505_v1  ;;  %s2160_s17 = scalar_lea.hbm %s2209_s3, %s1267_s28  ;;  %s1120_s21 = scalar_lea.sflag [#allocation6], %s1658_s30 }
  0x65   : > { %690 = vst.msk [vmem:[#allocation3 + $0x20] sm:$0x3] %vm243_vm0, %v1505_v1  ;;  %693 = vst.msk [vmem:[#allocation3 + $0x50] sm:$0x3] %vm243_vm0, %v1505_v1  ;;  %s1428_s22 = scalar_lea.vmem %s2162_s29, 512  ;;  %p2225_p10 = scmp.ne.s32.totalorder %s2219_s10, 0 }
  0x66   : > { %694 = vst.msk [vmem:[#allocation3 + $0x8] sm:$0xff] %vm248_vm4, %v1505_v1  ;;  %697 = vst.msk [vmem:[#allocation3 + $0x38] sm:$0xff] %vm248_vm4, %v1505_v1  ;;  %p1429_p11 = scmp.ne.s32.totalorder %s2162_s29, %s1428_s22  ;;  %s1509_s16 = smov [#allocation10]  }
  0x67   : > { %696 = vst.msk [vmem:[#allocation3 + $0x28] sm:$0x3] %vm251_vm1, %v1505_v1  ;;  %699 = vst.msk [vmem:[#allocation3 + $0x58] sm:$0x3] %vm251_vm1, %v1505_v1  ;;  %s1432_s23 = sshll.u32 %s1509_s16, 4  ;;  %s1433_s23 = int_to_ptr.vmem [resolvable:$false] %s1432_s23 }
  0x68   : > { %p1430_p1 = pnand %p1429_p11, %p2225_p10  ;;  %s1434_s24 = scalar_lea.vmem %s1433_s23, 1024 }
  0x69   : > { %p1435_p6 = scmp.lt.s32.totalorder %s2162_s29, %s1433_s23  ;;  %p1436_p12 = scmp.lt.s32.totalorder %s1434_s24, %s1428_s22 }
  0x6a   : > { %p1431_p2 = pneg %p1430_p1 }
  0x6b   : > { %p1437_p7 = por %p1436_p12, %p1435_p6 }
  0x6d   : > { %p1438_p9 = pnand %p1437_p7, %p1431_p2 }
  0xcb   : > { %v272_v12 = vpop.permute.xlu1 %271  ;;  %v268_v13 = vpop.permute.xlu0 %267 }
  0xcc   : > { %293 = vst.msk [vmem:[#allocation2 + $0x20] sm:$0x1] %vm292_vm6, %v272_v12 }
  0xcd   : > { %295 = vst.msk [vmem:[#allocation2 + $0x28] sm:$0x1] %vm294_vm7, %v272_v12 }
  0xce   : > { %286 = vst.msk [vmem:[#allocation2] sm:$0xfe] %vm285_vm8, %v268_v13 }
  0xcf   : > { %288 = vst.msk [vmem:[#allocation2 + $0x8] sm:$0xfe] %vm287_vm9, %v268_v13  ;;  %v274_v14 = vpop.permute.xlu1 %273  ;;  %v270_v15 = vpop.permute.xlu0 %269 }
  0xd0   : > { %296 = vst.msk [vmem:[#allocation2 + $0x30] sm:$0xfe] %vm285_vm8, %v274_v14 }
  0xd1   : > { %297 = vst.msk [vmem:[#allocation2 + $0x38] sm:$0xfe] %vm287_vm9, %v274_v14 }
  0xd2   : > { %290 = vst.msk [vmem:[#allocation2 + $0x10] sm:$0xff] %vm289_vm10, %v270_v15 }
  0xd3   : > { %291 = vst.msk [vmem:[#allocation2 + $0x18] sm:$0xff] %vm240_vm2, %v270_v15  ;;  %v276_v16 = vpop.permute.xlu0 %275  ;;  %v278_v19 = vpop.permute.xlu1 %277  ;;  %v1738_v22 = vld [vmem:[#allocation2 + $0x20] sm:$0x3] }
  0xd4   : > { %298 = vst.msk [vmem:[#allocation2 + $0x40] sm:$0xff] %vm289_vm10, %v276_v16  ;;  %v331_v25 = vmul.f32 %v1241_v23, %v1738_v22  ;;  %v368_v34 = vmul.f32 %v1242_v24, %v1738_v22  ;;  %v307_v15 = vld [vmem:[#allocation2 + $0x28] sm:$0x3] }
  0xd5   : > { %v1720_v18 = vld [vmem:[#allocation2] sm:$0xff]  ;;  %299 = vst.msk [vmem:[#allocation2 + $0x48] sm:$0xff] %vm240_vm2, %v276_v16 }
  0xd6   : > { %v1718_v17 = vld [vmem:[#allocation2 + $0x8] sm:$0xff]  ;;  %410 = vrot.lane.b32.xlu0 %v1720_v18, %s1507_s20  ;;  %300 = vst.msk [vmem:[#allocation2 + $0x50] sm:$0x1] %vm292_vm6, %v278_v19  ;;  %v329_v27 = vmul.f32 %v1241_v23, %v1720_v18  ;;  %v366_v30 = vmul.f32 %v1242_v24, %v1720_v18  ;;  %v319_v32 = vmul.f32 %v1240_v26, %v1720_v18  ;;  %v345_v33 = vrot.slane %v331_v25, 1 }
  0xd7   : > { %412 = vrot.lane.b32.xlu1 %v1718_v17, %s1507_s20  ;;  %301 = vst.msk [vmem:[#allocation2 + $0x58] sm:$0x1] %vm294_vm7, %v278_v19  ;;  %v1732_v21 = vld [vmem:[#allocation2 + $0x30] sm:$0xff]  ;;  %v382_v51 = vrot.slane %v368_v34, 2  ;;  %v455_v13 = vrot.slane %v1718_v17, 1  ;;  %v452_v14 = vrot.slane %v1720_v18, 1 }
  0xd8   : > { %v1730_v20 = vld [vmem:[#allocation2 + $0x38] sm:$0xff]  ;;  %v342_v37 = vrot.slane %v329_v27, 1  ;;  %v379_v39 = vrot.slane %v366_v30, 2  ;;  %v321_v40 = vmul.f32 %v1240_v26, %v1732_v21  ;;  %v332_v41 = vmul.f32 %v1241_v23, %v1732_v21 }
  0xd9   : > { %v1746_v28 = vld [vmem:[#allocation2 + $0x10] sm:$0xff]  ;;  %v369_v45 = vmul.f32 %v1242_v24, %v1732_v21  ;;  %v462_v34 = vrot.slane %v1732_v21, 1 }
  0xda   : > { %418 = vrot.lane.b32.xlu0 %v1732_v21, %s1507_s20  ;;  %v330_v36 = vmul.f32 %v1241_v23, %v1746_v28  ;;  %v367_v38 = vmul.f32 %v1242_v24, %v1746_v28  ;;  %v1767_v47 = vld [vmem:[#allocation2 + $0x18] sm:$0xff]  ;;  %v347_v48 = vrot.slane %v332_v41, 1  ;;  %v320_v50 = vmul.f32 %v1240_v26, %v1746_v28 }
  0xdb   : > { %420 = vrot.lane.b32.xlu1 %v1730_v20, %s1507_s20  ;;  %v1751_v31 = vld [vmem:[#allocation2 + $0x40] sm:$0xff]  ;;  %v384_v54 = vrot.slane %v369_v45, 2  ;;  %v456_v11 = vrot.slane %v1767_v47, 1  ;;  %v453_v12 = vrot.slane %v1746_v28, 1  ;;  %v513_v41 = vrot.slane %v1767_v47, 2 }
  0xdc   : > { %v333_v42 = vmul.f32 %v1241_v23, %v1751_v31  ;;  %v343_v43 = vrot.slane %v330_v36, 1  ;;  %v380_v44 = vrot.slane %v367_v38, 2  ;;  %v370_v46 = vmul.f32 %v1242_v24, %v1751_v31  ;;  %v1781_v0 = vld [vmem:[#allocation2 + $0x48] sm:$0xff] }
  0xdd   : > { %v1748_v29 = vld [vmem:[#allocation2 + $0x50] sm:$0x3]  ;;  %v322_v63 = vmul.f32 %v1240_v26, %v1751_v31  ;;  %v457_v16 = vsel %vm341_vm11, %v455_v13, %v456_v11  ;;  %v454_v19 = vsel %vm341_vm11, %v452_v14, %v453_v12  ;;  %v466_v27 = vrot.slane %v1781_v0, 1 }
  0xde   : > { %566 = vrot.lane.b32.xlu0 %v1720_v18, %s1508_s25  ;;  %v334_v35 = vmul.f32 %v1241_v23, %v1748_v29  ;;  %v348_v49 = vrot.slane %v333_v42, 1  ;;  %v344_v52 = vsel %vm341_vm11, %v342_v37, %v343_v43  ;;  %v381_v53 = vsel %vm378_vm12, %v379_v39, %v380_v44 }
  0xdf   : > { %568 = vrot.lane.b32.xlu1 %v1718_v17, %s1508_s25  ;;  %v385_v55 = vrot.slane %v370_v46, 2  ;;  %v356_v56 = vadd.f32 %v344_v52, %v319_v32  ;;  %v346_v58 = vsel %vm341_vm11, %v343_v43, %v345_v33  ;;  %v383_v59 = vsel %vm378_vm12, %v380_v44, %v382_v51  ;;  %v313_v32 = vld [vmem:[#allocation2 + $0x58] sm:$0x3] }
  0xe0   : > { %v349_v57 = vsel %vm341_vm11, %v347_v48, %v348_v49  ;;  %v357_v62 = vadd.f32 %v346_v58, %v320_v50  ;;  %v350_v2 = vrot.slane %v334_v35, 1  ;;  %v371_v3 = vmul.f32 %v1242_v24, %v1748_v29 }
  0xe1   : > { %v358_v60 = vadd.f32 %v349_v57, %v321_v40  ;;  %v386_v61 = vsel %vm378_vm12, %v384_v54, %v385_v55  ;;  %v1783_v1 = vadd.f32 %v381_v53, %v356_v56  ;;  %v460_v23 = vrot.slane %v307_v15, 1 }
  0xe2   : > { %574 = vrot.lane.b32.xlu0 %v1732_v21, %s1508_s25  ;;  %v1792_v5 = vadd.f32 %v383_v59, %v357_v62  ;;  %v351_v6 = vsel %vm341_vm11, %v348_v49, %v350_v2  ;;  %v387_v7 = vrot.slane %v371_v3, 2  ;;  %v458_v24 = vrot.slane %v1738_v22, 1 }
  0xe3   : > { %576 = vrot.lane.b32.xlu1 %v1730_v20, %s1508_s25  ;;  %v1790_v4 = vadd.f32 %v386_v61, %v358_v60  ;;  %v359_v8 = vadd.f32 %v351_v6, %v322_v63  ;;  %v461_v25 = vsel %vm341_vm11, %v456_v11, %v460_v23  ;;  %v463_v30 = vrot.slane %v1751_v31, 1 }
  0xe4   : > { %v388_v9 = vsel %vm378_vm12, %v385_v55, %v387_v7  ;;  %v459_v26 = vsel %vm341_vm11, %v453_v12, %v458_v24  ;;  %v465_v33 = vrot.slane %v1730_v20, 1  ;;  %v470_v37 = vrot.slane %v313_v32, 1  ;;  %v1244_v24 = vld [vmem:[#allocation7 + $0x5] ss:$0 sm:$0xff] }
  0xe5   : > { %v1800_v10 = vadd.f32 %v388_v9, %v359_v8  ;;  %v464_v36 = vsel %vm341_vm11, %v462_v34, %v463_v30  ;;  %v468_v38 = vrot.slane %v1748_v29, 1  ;;  %v510_v42 = vrot.slane %v1746_v28, 2 }
  0xe6   : > { %414 = vrot.lane.b32.xlu0 %v1746_v28, %s1507_s20  ;;  %v467_v35 = vsel %vm341_vm11, %v465_v33, %v466_v27  ;;  %v471_v39 = vsel %vm341_vm11, %v466_v27, %v470_v37  ;;  %v512_v43 = vrot.slane %v1718_v17, 2  ;;  %v509_v44 = vrot.slane %v1720_v18, 2  ;;  %v1890_v33 = vld [vmem:[#allocation7 + $0x9] ss:$0 sm:$0xff] }
  0xe7   : > { %416 = vrot.lane.b32.xlu1 %v1767_v47, %s1507_s20  ;;  %v469_v40 = vsel %vm341_vm11, %v463_v30, %v468_v38  ;;  %v517_v48 = vrot.slane %v307_v15, 2  ;;  %v523_v50 = vrot.slane %v1781_v0, 2  ;;  %v520_v17 = vrot.slane %v1751_v31, 2  ;;  %v1894_v38 = vld [vmem:[#allocation7 + $0x2] ss:$0 sm:$0xff] }
  0xe8   : > { %v514_v45 = vsel %vm378_vm12, %v512_v43, %v513_v41  ;;  %v511_v46 = vsel %vm378_vm12, %v509_v44, %v510_v42  ;;  %v522_v18 = vrot.slane %v1730_v20, 2  ;;  %v519_v51 = vrot.slane %v1732_v21, 2 }
  0xe9   : > { %v527_v53 = vrot.slane %v313_v32, 2  ;;  %v525_v54 = vrot.slane %v1748_v29, 2 }
  0xea   : > { %422 = vrot.lane.b32.xlu0 %v1751_v31, %s1507_s20  ;;  %v524_v52 = vsel %vm378_vm12, %v522_v18, %v523_v50 }
  0xeb   : > { %424 = vrot.lane.b32.xlu1 %v1781_v0, %s1507_s20  ;;  %v526_v55 = vsel %vm378_vm12, %v520_v17, %v525_v54 }
  0xee   : > { %570 = vrot.lane.b32.xlu0 %v1746_v28, %s1508_s25  ;;  %v518_v28 = vsel %vm378_vm12, %v513_v41, %v517_v48 }
  0xef   : > { %572 = vrot.lane.b32.xlu1 %v1767_v47, %s1508_s25  ;;  %v515_v47 = vrot.slane %v1738_v22, 2  ;;  %v521_v22 = vsel %vm378_vm12, %v519_v51, %v520_v17 }
  0xf1   : > { %v516_v49 = vsel %vm378_vm12, %v510_v42, %v515_v47 }
  0xf2   : > { %578 = vrot.lane.b32.xlu0 %v1751_v31, %s1508_s25  ;;  %v528_v31 = vsel %vm378_vm12, %v523_v50, %v527_v53 }
  0xf3   : > { %580 = vrot.lane.b32.xlu1 %v1781_v0, %s1508_s25 }
  0xf6   : > { %472 = vrot.lane.b32.xlu0 %v454_v19, %s1507_s20 }
  0xf7   : > { %474 = vrot.lane.b32.xlu1 %v457_v16, %s1507_s20 }
  0xfa   : > { %476 = vrot.lane.b32.xlu0 %v459_v26, %s1507_s20 }
  0xfb   : > { %478 = vrot.lane.b32.xlu1 %v461_v25, %s1507_s20 }
  0xfe   : > { %480 = vrot.lane.b32.xlu0 %v464_v36, %s1507_s20 }
  0xff   : > { %482 = vrot.lane.b32.xlu1 %v467_v35, %s1507_s20 }
 0x102   : > { %484 = vrot.lane.b32.xlu0 %v469_v40, %s1507_s20 }
 0x103   : > { %486 = vrot.lane.b32.xlu1 %v471_v39, %s1507_s20 }
 0x106   : > { %529 = vrot.lane.b32.xlu0 %v511_v46, %s1507_s20 }
 0x107   : > { %531 = vrot.lane.b32.xlu1 %v514_v45, %s1507_s20 }
 0x10a   : > { %533 = vrot.lane.b32.xlu0 %v516_v49, %s1507_s20 }
 0x10b   : > { %535 = vrot.lane.b32.xlu1 %v518_v28, %s1507_s20 }
 0x10e   : > { %537 = vrot.lane.b32.xlu0 %v521_v22, %s1507_s20 }
 0x10f   : > { %539 = vrot.lane.b32.xlu1 %v524_v52, %s1507_s20 }
 0x112   : > { %541 = vrot.lane.b32.xlu0 %v526_v55, %s1507_s20 }
 0x113   : > { %543 = vrot.lane.b32.xlu1 %v528_v31, %s1507_s20 }
 0x116   : > { %604 = vrot.lane.b32.xlu0 %v454_v19, %s1508_s25  ;;  %v1243_v19 = vld [vmem:[#allocation7 + $0x1] ss:$0 sm:$0xff] }
 0x117   : > { %606 = vrot.lane.b32.xlu1 %v457_v16, %s1508_s25 }
 0x11a   : > { %608 = vrot.lane.b32.xlu0 %v459_v26, %s1508_s25 }
 0x11b   : > { %610 = vrot.lane.b32.xlu1 %v461_v25, %s1508_s25 }
 0x11e   : > { %612 = vrot.lane.b32.xlu0 %v464_v36, %s1508_s25 }
 0x11f   : > { %614 = vrot.lane.b32.xlu1 %v467_v35, %s1508_s25 }
 0x122   : > { %616 = vrot.lane.b32.xlu0 %v469_v40, %s1508_s25 }
 0x123   : > { %618 = vrot.lane.b32.xlu1 %v471_v39, %s1508_s25 }
 0x126   : > { %641 = vrot.lane.b32.xlu0 %v511_v46, %s1508_s25 }
 0x127   : > { %643 = vrot.lane.b32.xlu1 %v514_v45, %s1508_s25 }
 0x12a   : > { %645 = vrot.lane.b32.xlu0 %v516_v49, %s1508_s25 }
 0x12b   : > { %647 = vrot.lane.b32.xlu1 %v518_v28, %s1508_s25 }
 0x12e   : > { %649 = vrot.lane.b32.xlu0 %v521_v22, %s1508_s25 }
 0x12f   : > { %651 = vrot.lane.b32.xlu1 %v524_v52, %s1508_s25 }
 0x132   : > { %653 = vrot.lane.b32.xlu0 %v526_v55, %s1508_s25 }
 0x133   : > { %655 = vrot.lane.b32.xlu1 %v528_v31, %s1508_s25 }
 0x148   : > { %v411_v21 = vpop.permute.xlu0 %410 }
 0x149   : > { %v413_v20 = vpop.permute.xlu1 %412 }
 0x14a   : > { %v427_v23 = vsel %vm426_vm14, %v411_v21, %v413_v20 }
 0x14b   : > { %v435_v26 = vmul.f32 %v1243_v19, %v427_v23 }
 0x14c   : > { %v419_v56 = vpop.permute.xlu0 %418 }
 0x14d   : > { %v421_v29 = vpop.permute.xlu1 %420  ;;  %v439_v34 = vadd.f32 %v435_v26, %v1783_v1 }
 0x14e   : > { %v429_v37 = vsel %vm426_vm14, %v419_v56, %v421_v29 }
 0x14f   : > { %v437_v43 = vmul.f32 %v1243_v19, %v429_v37 }
 0x150   : > { %v567_v58 = vpop.permute.xlu0 %566 }
 0x151   : > { %v569_v57 = vpop.permute.xlu1 %568  ;;  %v441_v28 = vadd.f32 %v437_v43, %v1790_v4 }
 0x152   : > { %v583_v59 = vsel %vm582_vm13, %v567_v58, %v569_v57 }
 0x153   : > { %v591_v44 = vmul.f32 %v1894_v38, %v583_v59 }
 0x154   : > { %v575_v61 = vpop.permute.xlu0 %574 }
 0x155   : > { %v577_v60 = vpop.permute.xlu1 %576 }
 0x156   : > { %v585_v62 = vsel %vm582_vm13, %v575_v61, %v577_v60 }
 0x157   : > { %v593_v52 = vmul.f32 %v1894_v38, %v585_v62 }
 0x158   : > { %v415_v0 = vpop.permute.xlu0 %414 }
 0x159   : > { %v417_v63 = vpop.permute.xlu1 %416 }
 0x15a   : > { %v428_v56 = vsel %vm426_vm14, %v415_v0, %v417_v63 }
 0x15b   : > { %v436_v57 = vmul.f32 %v1243_v19, %v428_v56 }
 0x15c   : > { %v1878_v3 = vpop.permute.xlu0 %422 }
 0x15d   : > { %v1876_v2 = vpop.permute.xlu1 %424 }
 0x160   : > { %v1882_v7 = vpop.permute.xlu0 %570 }
 0x161   : > { %v1880_v6 = vpop.permute.xlu1 %572 }
 0x162   : > { %v584_v26 = vsel %vm582_vm13, %v1882_v7, %v1880_v6 }
 0x164   : > { %v1886_v9 = vpop.permute.xlu0 %578 }
 0x165   : > { %v1884_v8 = vpop.permute.xlu1 %580 }
 0x168   : > { %v473_v12 = vpop.permute.xlu0 %472 }
 0x169   : > { %v475_v11 = vpop.permute.xlu1 %474 }
 0x16a   : > { %v488_v25 = vsel %vm426_vm14, %v473_v12, %v475_v11  ;;  %v1247_v11 = vld [vmem:[#allocation7 + $0x6] ss:$0 sm:$0xff]  ;;  %v440_v12 = vadd.f32 %v436_v57, %v1792_v5  ;;  %v1248_v5 = vld [vmem:[#allocation7 + $0xa] ss:$0 sm:$0xff] }
 0x16b   : > { %v496_v32 = vmul.f32 %v1244_v24, %v488_v25 }
 0x16c   : > { %v477_v14 = vpop.permute.xlu0 %476 }
 0x16d   : > { %v479_v13 = vpop.permute.xlu1 %478  ;;  %v500_v40 = vadd.f32 %v496_v32, %v439_v34 }
 0x16e   : > { %v489_v4 = vsel %vm426_vm14, %v477_v14, %v479_v13 }
 0x16f   : > { %v497_v61 = vmul.f32 %v1244_v24, %v489_v4 }
 0x170   : > { %v481_v16 = vpop.permute.xlu0 %480 }
 0x171   : > { %v483_v15 = vpop.permute.xlu1 %482  ;;  %v501_v13 = vadd.f32 %v497_v61, %v440_v12 }
 0x172   : > { %v490_v42 = vsel %vm426_vm14, %v481_v16, %v483_v15  ;;  %v430_v15 = vsel %vm426_vm14, %v1878_v3, %v1876_v2 }
 0x173   : > { %v498_v1 = vmul.f32 %v1244_v24, %v490_v42  ;;  %v438_v25 = vmul.f32 %v1243_v19, %v430_v15 }
 0x174   : > { %v485_v30 = vpop.permute.xlu0 %484 }
 0x175   : > { %v487_v27 = vpop.permute.xlu1 %486  ;;  %v502_v18 = vadd.f32 %v498_v1, %v441_v28 }
 0x176   : > { %v491_v14 = vsel %vm426_vm14, %v485_v30, %v487_v27 }
 0x177   : > { %v499_v2 = vmul.f32 %v1244_v24, %v491_v14  ;;  %v586_v24 = vsel %vm582_vm13, %v1886_v9, %v1884_v8 }
 0x178   : > { %v530_v36 = vpop.permute.xlu0 %529 }
 0x179   : > { %v532_v35 = vpop.permute.xlu1 %531 }
 0x17a   : > { %v545_v39 = vsel %vm426_vm14, %v530_v36, %v532_v35 }
 0x17b   : > { %v553_v41 = vmul.f32 %v1890_v33, %v545_v39  ;;  %v592_v39 = vmul.f32 %v1894_v38, %v584_v26  ;;  %v1250_v26 = vld [vmem:[#allocation9 + $0x4] ss:$0 sm:$0xff] }
 0x17c   : > { %v534_v48 = vpop.permute.xlu0 %533 }
 0x17d   : > { %v557_v45 = vadd.f32 %v553_v41, %v500_v40  ;;  %v536_v46 = vpop.permute.xlu1 %535  ;;  %v442_v40 = vadd.f32 %v438_v25, %v1800_v10 }
 0x17e   : > { %v546_v60 = vsel %vm426_vm14, %v534_v48, %v536_v46 }
 0x17f   : > { %v595_v47 = vadd.f32 %v591_v44, %v557_v45  ;;  %v554_v16 = vmul.f32 %v1890_v33, %v546_v60  ;;  %v503_v45 = vadd.f32 %v499_v2, %v442_v40 }
 0x180   : > { %v538_v50 = vpop.permute.xlu0 %537 }
 0x181   : > { %v540_v49 = vpop.permute.xlu1 %539  ;;  %v558_v34 = vadd.f32 %v554_v16, %v501_v13 }
 0x182   : > { %v547_v17 = vsel %vm426_vm14, %v538_v50, %v540_v49 }
 0x183   : > { %v555_v51 = vmul.f32 %v1890_v33, %v547_v17  ;;  %v596_v41 = vadd.f32 %v592_v39, %v558_v34 }
 0x184   : > { %v542_v54 = vpop.permute.xlu0 %541 }
 0x185   : > { %v559_v22 = vadd.f32 %v555_v51, %v502_v18  ;;  %v544_v53 = vpop.permute.xlu1 %543  ;;  %v594_v51 = vmul.f32 %v1894_v38, %v586_v24 }
 0x186   : > { %v548_v3 = vsel %vm426_vm14, %v542_v54, %v544_v53 }
 0x187   : > { %v597_v31 = vadd.f32 %v593_v52, %v559_v22  ;;  %v556_v7 = vmul.f32 %v1890_v33, %v548_v3 }
 0x188   : > { %v605_v20 = vpop.permute.xlu0 %604 }
 0x189   : > { %v607_v55 = vpop.permute.xlu1 %606  ;;  %v560_v49 = vadd.f32 %v556_v7, %v503_v45 }
 0x18a   : > { %v620_v62 = vsel %vm582_vm13, %v605_v20, %v607_v55 }
 0x18b   : > { %v628_v23 = vmul.f32 %v1247_v11, %v620_v62  ;;  %v598_v54 = vadd.f32 %v594_v51, %v560_v49 }
 0x18c   : > { %v609_v29 = vpop.permute.xlu0 %608 }
 0x18d   : > { %v611_v21 = vpop.permute.xlu1 %610  ;;  %v632_v27 = vadd.f32 %v628_v23, %v595_v47 }
 0x18e   : > { %v621_v32 = vsel %vm582_vm13, %v609_v29, %v611_v21 }
 0x18f   : > { %v629_v30 = vmul.f32 %v1247_v11, %v621_v32  ;;  %v1251_v32 = vld [vmem:[#allocation9 + $0x8] ss:$0 sm:$0xff] }
 0x190   : > { %v613_v59 = vpop.permute.xlu0 %612 }
 0x191   : > { %v615_v58 = vpop.permute.xlu1 %614  ;;  %v633_v48 = vadd.f32 %v629_v30, %v596_v41 }
 0x192   : > { %v622_v6 = vsel %vm582_vm13, %v613_v59, %v615_v58 }
 0x193   : > { %v630_v1 = vmul.f32 %v1247_v11, %v622_v6 }
 0x194   : > { %v617_v0 = vpop.permute.xlu0 %616 }
 0x195   : > { %v619_v63 = vpop.permute.xlu1 %618  ;;  %v634_v22 = vadd.f32 %v630_v1, %v597_v31 }
 0x196   : > { %v623_v10 = vsel %vm582_vm13, %v617_v0, %v619_v63 }
 0x197   : > { %v631_v8 = vmul.f32 %v1247_v11, %v623_v10 }
 0x198   : > { %v642_v36 = vpop.permute.xlu0 %641 }
 0x199   : > { %v644_v35 = vpop.permute.xlu1 %643  ;;  %v635_v4 = vadd.f32 %v631_v8, %v598_v54 }
 0x19a   : > { %v657_v37 = vsel %vm582_vm13, %v642_v36, %v644_v35 }
 0x19b   : > { %v665_v19 = vmul.f32 %v1248_v5, %v657_v37  ;;  %v1249_v37 = vld [vmem:[#allocation9] ss:$0 sm:$0xff] }
 0x19c   : > { %v646_v44 = vpop.permute.xlu0 %645 }
 0x19d   : > { %v669_v42 = vadd.f32 %v665_v19, %v632_v27  ;;  %v648_v43 = vpop.permute.xlu1 %647 }
 0x19e   : > { %v658_v46 = vsel %vm582_vm13, %v646_v44, %v648_v43 }
 0x19f   : > { %v666_v47 = vmul.f32 %v1248_v5, %v658_v46  ;;  %v673_v28 = vmax.f32 %v669_v42, 0.0 }
 0x1a0   : > { %v650_v17 = vpop.permute.xlu0 %649 }
 0x1a1   : > { %v670_v50 = vadd.f32 %v666_v47, %v633_v48  ;;  %v652_v33 = vpop.permute.xlu1 %651  ;;  %v704_v18 = vrot.slane %v673_v28, 7 }
 0x1a2   : > { %v659_v52 = vsel %vm582_vm13, %v650_v17, %v652_v33 }
 0x1a3   : > { %v667_v9 = vmul.f32 %v1248_v5, %v659_v52  ;;  %710 = vrot.lane.b32.xlu0 %v704_v18, %s1506_s18  ;;  %v674_v53 = vmax.f32 %v670_v50, 0.0 }
 0x1a4   : > { %v654_v21 = vpop.permute.xlu0 %653 }
 0x1a5   : > { %v671_v55 = vadd.f32 %v667_v9, %v634_v22  ;;  %v656_v20 = vpop.permute.xlu1 %655  ;;  %v705_v29 = vrot.slane %v674_v53, 7 }
 0x1a6   : > { %v660_v56 = vsel %vm582_vm13, %v654_v21, %v656_v20 }
 0x1a7   : > { %v668_v57 = vmul.f32 %v1248_v5, %v660_v56  ;;  %714 = vrot.lane.b32.xlu0 %v705_v29, %s1506_s18  ;;  %v675_v38 = vmax.f32 %v671_v55, 0.0  ;;  %v706_v58 = vsel %vm260_vm5, %v704_v18, %v705_v29 }
 0x1a9   : > { %v672_v31 = vadd.f32 %v668_v57, %v635_v4  ;;  %v707_v59 = vrot.slane %v675_v38, 7 }
 0x1ab   : > { %716 = vrot.lane.b32.xlu1 %v707_v59, %s1506_s18  ;;  %v676_v60 = vmax.f32 %v672_v31, 0.0 }
 0x1ad   : > { %v708_v61 = vrot.slane %v676_v60, 7 }
 0x1af   : > { %720 = vrot.lane.b32.xlu1 %v708_v61, %s1506_s18  ;;  %v709_v11 = vsel %vm260_vm5, %v707_v59, %v708_v61 }
 0x1b0   : > { %718 = vrot.lane.b32.xlu0 %v709_v11, %s1506_s18 }
 0x1b3   : > { %712 = vrot.lane.b32.xlu1 %v706_v58, %s1506_s18 }
 0x215   : > { %v711_v62 = vpop.permute.xlu0 %710 }
 0x216   : > { %728 = vst.msk [vmem:[#allocation3] sm:$0xfe] %vm285_vm8, %v711_v62 }
 0x217   : > { %729 = vst.msk [vmem:[#allocation3 + $0x8] sm:$0xfe] %vm287_vm9, %v711_v62 }
 0x219   : > { %v715_v12 = vpop.permute.xlu0 %714 }
 0x21a   : > { %732 = vst.msk [vmem:[#allocation3 + $0x20] sm:$0x1] %vm292_vm6, %v715_v12 }
 0x21b   : > { %733 = vst.msk [vmem:[#allocation3 + $0x28] sm:$0x1] %vm294_vm7, %v715_v12 }
 0x21d   : > { %v717_v15 = vpop.permute.xlu1 %716  ;;  %v1946_v63 = vld [vmem:[#allocation3] sm:$0xff] }
 0x21e   : > { %v1944_v16 = vld [vmem:[#allocation3 + $0x8] sm:$0xff]  ;;  %734 = vst.msk [vmem:[#allocation3 + $0x30] sm:$0xfe] %vm285_vm8, %v717_v15  ;;  %846 = vrot.lane.b32.xlu0 %v1946_v63, %s1507_s20  ;;  %v767_v36 = vmul.f32 %v1250_v26, %v1946_v63  ;;  %v803_v2 = vmul.f32 %v1251_v32, %v1946_v63  ;;  %v757_v41 = vmul.f32 %v1249_v37, %v1946_v63 }
 0x21f   : > { %735 = vst.msk [vmem:[#allocation3 + $0x38] sm:$0xfe] %vm287_vm9, %v717_v15  ;;  %848 = vrot.lane.b32.xlu1 %v1944_v16, %s1507_s20  ;;  %v890_v12 = vrot.slane %v1944_v16, 1  ;;  %v887_v15 = vrot.slane %v1946_v63, 1 }
 0x220   : > { %v779_v42 = vrot.slane %v767_v36, 1  ;;  %v815_v43 = vrot.slane %v803_v2, 2 }
 0x221   : > { %v721_v0 = vpop.permute.xlu1 %720  ;;  %v1972_v5 = vld [vmem:[#allocation3 + $0x20] sm:$0x3] }
 0x222   : > { %738 = vst.msk [vmem:[#allocation3 + $0x50] sm:$0x1] %vm292_vm6, %v721_v0  ;;  %v719_v13 = vpop.permute.xlu0 %718  ;;  %v769_v3 = vmul.f32 %v1250_v26, %v1972_v5  ;;  %v805_v30 = vmul.f32 %v1251_v32, %v1972_v5 }
 0x223   : > { %739 = vst.msk [vmem:[#allocation3 + $0x58] sm:$0x1] %vm294_vm7, %v721_v0  ;;  %v745_v0 = vld [vmem:[#allocation3 + $0x28] sm:$0x3] }
 0x224   : > { %736 = vst.msk [vmem:[#allocation3 + $0x40] sm:$0xff] %vm289_vm10, %v719_v13  ;;  %v782_v46 = vrot.slane %v769_v3, 1  ;;  %v818_v48 = vrot.slane %v805_v30, 2 }
 0x225   : > { %737 = vst.msk [vmem:[#allocation3 + $0x48] sm:$0xff] %vm240_vm2, %v719_v13  ;;  %v713_v14 = vpop.permute.xlu1 %712  ;;  %v1960_v25 = vld [vmem:[#allocation3 + $0x30] sm:$0xff] }
 0x226   : > { %v1958_v23 = vld [vmem:[#allocation3 + $0x38] sm:$0xff]  ;;  %730 = vst.msk [vmem:[#allocation3 + $0x10] sm:$0xff] %vm289_vm10, %v713_v14  ;;  %854 = vrot.lane.b32.xlu0 %v1960_v25, %s1507_s20  ;;  %v770_v39 = vmul.f32 %v1250_v26, %v1960_v25  ;;  %v806_v27 = vmul.f32 %v1251_v32, %v1960_v25  ;;  %v759_v49 = vmul.f32 %v1249_v37, %v1960_v25  ;;  %v897_v30 = vrot.slane %v1960_v25, 1 }
 0x227   : > { %731 = vst.msk [vmem:[#allocation3 + $0x18] sm:$0xff] %vm240_vm2, %v713_v14  ;;  %856 = vrot.lane.b32.xlu1 %v1958_v23, %s1507_s20 }
 0x228   : > { %v784_v24 = vrot.slane %v770_v39, 1  ;;  %v820_v45 = vrot.slane %v806_v27, 2  ;;  %v900_v27 = vrot.slane %v1958_v23, 1 }
 0x229   : > { %v1976_v35 = vld [vmem:[#allocation3 + $0x50] sm:$0x3] }
 0x22a   : > { %1001 = vrot.lane.b32.xlu0 %v1946_v63, %s1508_s25  ;;  %v772_v7 = vmul.f32 %v1250_v26, %v1976_v35  ;;  %v808_v17 = vmul.f32 %v1251_v32, %v1976_v35  ;;  %v751_v39 = vld [vmem:[#allocation3 + $0x58] sm:$0x3] }
 0x22b   : > { %1003 = vrot.lane.b32.xlu1 %v1944_v16, %s1508_s25  ;;  %v1974_v34 = vld [vmem:[#allocation3 + $0x40] sm:$0xff] }
 0x22c   : > { %v771_v19 = vmul.f32 %v1250_v26, %v1974_v34  ;;  %v807_v40 = vmul.f32 %v1251_v32, %v1974_v34  ;;  %v760_v50 = vmul.f32 %v1249_v37, %v1974_v34  ;;  %v787_v33 = vrot.slane %v772_v7, 1  ;;  %v2007_v8 = vld [vmem:[#allocation3 + $0x48] sm:$0xff] }
 0x22d   : > { %v1990_v6 = vld [vmem:[#allocation3 + $0x10] sm:$0xff]  ;;  %v823_v55 = vrot.slane %v808_v17, 2  ;;  %v901_v3 = vrot.slane %v2007_v8, 1  ;;  %v905_v7 = vrot.slane %v751_v39, 1  ;;  %v962_v17 = vrot.slane %v751_v39, 2 }
 0x22e   : > { %1009 = vrot.lane.b32.xlu0 %v1960_v25, %s1508_s25  ;;  %v1994_v44 = vld [vmem:[#allocation3 + $0x18] sm:$0xff]  ;;  %v768_v1 = vmul.f32 %v1250_v26, %v1990_v6  ;;  %v804_v47 = vmul.f32 %v1251_v32, %v1990_v6  ;;  %v785_v28 = vrot.slane %v771_v19, 1  ;;  %v821_v10 = vrot.slane %v807_v40, 2 }
 0x22f   : > { %1011 = vrot.lane.b32.xlu1 %v1958_v23, %s1508_s25  ;;  %v758_v53 = vmul.f32 %v1249_v37, %v1990_v6  ;;  %v891_v11 = vrot.slane %v1994_v44, 1  ;;  %v888_v62 = vrot.slane %v1990_v6, 1  ;;  %v895_v26 = vrot.slane %v745_v0, 1 }
 0x230   : > { %v780_v18 = vrot.slane %v768_v1, 1  ;;  %v816_v51 = vrot.slane %v804_v47, 2  ;;  %v786_v52 = vsel %vm341_vm11, %v784_v24, %v785_v28  ;;  %v822_v22 = vsel %vm378_vm12, %v820_v45, %v821_v10 }
 0x231   : > { %v795_v9 = vadd.f32 %v786_v52, %v759_v49  ;;  %v788_v54 = vsel %vm341_vm11, %v785_v28, %v787_v33  ;;  %v824_v31 = vsel %vm378_vm12, %v821_v10, %v823_v55  ;;  %v892_v13 = vsel %vm341_vm11, %v890_v12, %v891_v11 }
 0x232   : > { %850 = vrot.lane.b32.xlu0 %v1990_v6, %s1507_s20  ;;  %v781_v20 = vsel %vm341_vm11, %v779_v42, %v780_v18  ;;  %v817_v21 = vsel %vm378_vm12, %v815_v43, %v816_v51  ;;  %v783_v29 = vsel %vm341_vm11, %v780_v18, %v782_v46  ;;  %v819_v38 = vsel %vm378_vm12, %v816_v51, %v818_v48 }
 0x233   : > { %852 = vrot.lane.b32.xlu1 %v1994_v44, %s1507_s20  ;;  %v793_v56 = vadd.f32 %v781_v20, %v757_v41  ;;  %v2018_v4 = vadd.f32 %v822_v22, %v795_v9  ;;  %v794_v57 = vadd.f32 %v783_v29, %v758_v53  ;;  %v796_v58 = vadd.f32 %v788_v54, %v760_v50 }
 0x234   : > { %v889_v14 = vsel %vm341_vm11, %v887_v15, %v888_v62  ;;  %v893_v32 = vrot.slane %v1972_v5, 1  ;;  %v896_v36 = vsel %vm341_vm11, %v891_v11, %v895_v26  ;;  %v898_v37 = vrot.slane %v1974_v34, 1 }
 0x235   : > { %v2022_v59 = vadd.f32 %v817_v21, %v793_v56  ;;  %v2024_v60 = vadd.f32 %v819_v38, %v794_v57  ;;  %v2030_v61 = vadd.f32 %v824_v31, %v796_v58  ;;  %v902_v19 = vsel %vm341_vm11, %v900_v27, %v901_v3 }
 0x236   : > { %858 = vrot.lane.b32.xlu0 %v1974_v34, %s1507_s20  ;;  %v894_v2 = vsel %vm341_vm11, %v888_v62, %v893_v32  ;;  %v899_v40 = vsel %vm341_vm11, %v897_v30, %v898_v37  ;;  %v903_v41 = vrot.slane %v1976_v35, 1  ;;  %v906_v42 = vsel %vm341_vm11, %v901_v3, %v905_v7  ;;  %v1253_v3 = vld [vmem:[#allocation9 + $0x5] ss:$0 sm:$0xff] }
 0x237   : > { %860 = vrot.lane.b32.xlu1 %v2007_v8, %s1507_s20  ;;  %v948_v24 = vrot.slane %v1994_v44, 2  ;;  %v945_v45 = vrot.slane %v1990_v6, 2  ;;  %v947_v46 = vrot.slane %v1944_v16, 2  ;;  %v944_v48 = vrot.slane %v1946_v63, 2 }
 0x238   : > { %v904_v43 = vsel %vm341_vm11, %v898_v37, %v903_v41  ;;  %v952_v28 = vrot.slane %v745_v0, 2  ;;  %v958_v49 = vrot.slane %v2007_v8, 2  ;;  %v955_v16 = vrot.slane %v1974_v34, 2  ;;  %v2119_v41 = vld [vmem:[#allocation9 + $0x2] ss:$0 sm:$0xff] }
 0x239   : > { %v949_v1 = vsel %vm378_vm12, %v947_v46, %v948_v24  ;;  %v946_v47 = vsel %vm378_vm12, %v944_v48, %v945_v45  ;;  %v957_v63 = vrot.slane %v1958_v23, 2  ;;  %v954_v50 = vrot.slane %v1960_v25, 2  ;;  %v2104_v23 = vld [vmem:[#allocation9 + $0x1] ss:$0 sm:$0xff] }
 0x23a   : > { %1005 = vrot.lane.b32.xlu0 %v1990_v6, %s1508_s25  ;;  %v953_v6 = vsel %vm378_vm12, %v948_v24, %v952_v28  ;;  %v960_v18 = vrot.slane %v1976_v35, 2 }
 0x23b   : > { %1007 = vrot.lane.b32.xlu1 %v1994_v44, %s1508_s25  ;;  %v950_v44 = vrot.slane %v1972_v5, 2  ;;  %v959_v33 = vsel %vm378_vm12, %v957_v63, %v958_v49  ;;  %v956_v5 = vsel %vm378_vm12, %v954_v50, %v955_v16 }
 0x23c   : > { %v961_v51 = vsel %vm378_vm12, %v955_v16, %v960_v18 }
 0x23d   : > { %v951_v10 = vsel %vm378_vm12, %v945_v45, %v950_v44 }
 0x23e   : > { %1013 = vrot.lane.b32.xlu0 %v1974_v34, %s1508_s25  ;;  %v963_v34 = vsel %vm378_vm12, %v958_v49, %v962_v17 }
 0x23f   : > { %1015 = vrot.lane.b32.xlu1 %v2007_v8, %s1508_s25 }
 0x242   : > { %907 = vrot.lane.b32.xlu0 %v889_v14, %s1507_s20 }
 0x243   : > { %909 = vrot.lane.b32.xlu1 %v892_v13, %s1507_s20 }
 0x246   : > { %911 = vrot.lane.b32.xlu0 %v894_v2, %s1507_s20 }
 0x247   : > { %913 = vrot.lane.b32.xlu1 %v896_v36, %s1507_s20 }
 0x24a   : > { %915 = vrot.lane.b32.xlu0 %v899_v40, %s1507_s20 }
 0x24b   : > { %917 = vrot.lane.b32.xlu1 %v902_v19, %s1507_s20 }
 0x24e   : > { %919 = vrot.lane.b32.xlu0 %v904_v43, %s1507_s20 }
 0x24f   : > { %921 = vrot.lane.b32.xlu1 %v906_v42, %s1507_s20 }
 0x252   : > { %964 = vrot.lane.b32.xlu0 %v946_v47, %s1507_s20 }
 0x253   : > { %966 = vrot.lane.b32.xlu1 %v949_v1, %s1507_s20 }
 0x256   : > { %968 = vrot.lane.b32.xlu0 %v951_v10, %s1507_s20 }
 0x257   : > { %970 = vrot.lane.b32.xlu1 %v953_v6, %s1507_s20 }
 0x25a   : > { %972 = vrot.lane.b32.xlu0 %v956_v5, %s1507_s20 }
 0x25b   : > { %974 = vrot.lane.b32.xlu1 %v959_v33, %s1507_s20 }
 0x25e   : > { %976 = vrot.lane.b32.xlu0 %v961_v51, %s1507_s20 }
 0x25f   : > { %978 = vrot.lane.b32.xlu1 %v963_v34, %s1507_s20 }
 0x262   : > { %1038 = vrot.lane.b32.xlu0 %v889_v14, %s1508_s25 }
 0x263   : > { %1040 = vrot.lane.b32.xlu1 %v892_v13, %s1508_s25 }
 0x266   : > { %1042 = vrot.lane.b32.xlu0 %v894_v2, %s1508_s25 }
 0x267   : > { %1044 = vrot.lane.b32.xlu1 %v896_v36, %s1508_s25 }
 0x26a   : > { %1046 = vrot.lane.b32.xlu0 %v899_v40, %s1508_s25 }
 0x26b   : > { %1048 = vrot.lane.b32.xlu1 %v902_v19, %s1508_s25  ;;  %v1254_v19 = vld [vmem:[#allocation9 + $0x9] ss:$0 sm:$0xff] }
 0x26e   : > { %1050 = vrot.lane.b32.xlu0 %v904_v43, %s1508_s25 }
 0x26f   : > { %1052 = vrot.lane.b32.xlu1 %v906_v42, %s1508_s25 }
 0x272   : > { %1075 = vrot.lane.b32.xlu0 %v946_v47, %s1508_s25 }
 0x273   : > { %1077 = vrot.lane.b32.xlu1 %v949_v1, %s1508_s25 }
 0x276   : > { %1079 = vrot.lane.b32.xlu0 %v951_v10, %s1508_s25 }
 0x277   : > { %1081 = vrot.lane.b32.xlu1 %v953_v6, %s1508_s25 }
 0x27a   : > { %1083 = vrot.lane.b32.xlu0 %v956_v5, %s1508_s25 }
 0x27b   : > { %1085 = vrot.lane.b32.xlu1 %v959_v33, %s1508_s25 }
 0x27e   : > { %1087 = vrot.lane.b32.xlu0 %v961_v51, %s1508_s25 }
 0x27f   : > { %1089 = vrot.lane.b32.xlu1 %v963_v34, %s1508_s25 }
 0x290   : > { %v847_v35 = vpop.permute.xlu0 %846 }
 0x291   : > { %v849_v25 = vpop.permute.xlu1 %848 }
 0x292   : > { %v862_v52 = vsel %vm426_vm14, %v847_v35, %v849_v25 }
 0x293   : > { %v870_v22 = vmul.f32 %v2104_v23, %v862_v52 }
 0x295   : > { %v874_v8 = vadd.f32 %v870_v22, %v2022_v59 }
 0x298   : > { %v855_v53 = vpop.permute.xlu0 %854 }
 0x299   : > { %v857_v9 = vpop.permute.xlu1 %856 }
 0x29a   : > { %v864_v54 = vsel %vm426_vm14, %v855_v53, %v857_v9 }
 0x29b   : > { %v872_v55 = vmul.f32 %v2104_v23, %v864_v54 }
 0x29c   : > { %v1002_v29 = vpop.permute.xlu0 %1001 }
 0x29d   : > { %v876_v20 = vadd.f32 %v872_v55, %v2018_v4  ;;  %v1004_v21 = vpop.permute.xlu1 %1003 }
 0x29e   : > { %v1017_v56 = vsel %vm582_vm13, %v1002_v29, %v1004_v21 }
 0x29f   : > { %v1025_v46 = vmul.f32 %v2119_v41, %v1017_v56 }
 0x2a0   : > { %v1010_v38 = vpop.permute.xlu0 %1009 }
 0x2a1   : > { %v1012_v57 = vpop.permute.xlu1 %1011 }
 0x2a2   : > { %v1019_v58 = vsel %vm582_vm13, %v1010_v38, %v1012_v57 }
 0x2a3   : > { %v1027_v50 = vmul.f32 %v2119_v41, %v1019_v58 }
 0x2a4   : > { %v851_v11 = vpop.permute.xlu0 %850 }
 0x2a5   : > { %v853_v31 = vpop.permute.xlu1 %852 }
 0x2a6   : > { %v863_v52 = vsel %vm426_vm14, %v851_v11, %v853_v31 }
 0x2a8   : > { %v859_v59 = vpop.permute.xlu0 %858 }
 0x2a9   : > { %v861_v62 = vpop.permute.xlu1 %860 }
 0x2aa   : > { %v865_v56 = vsel %vm426_vm14, %v859_v59, %v861_v62 }
 0x2ac   : > { %v1006_v15 = vpop.permute.xlu0 %1005 }
 0x2ad   : > { %v1008_v12 = vpop.permute.xlu1 %1007 }
 0x2b0   : > { %v2116_v13 = vpop.permute.xlu0 %1013 }
 0x2b1   : > { %v2114_v0 = vpop.permute.xlu1 %1015 }
 0x2b4   : > { %v908_v4 = vpop.permute.xlu0 %907 }
 0x2b5   : > { %v910_v14 = vpop.permute.xlu1 %909 }
 0x2b6   : > { %v923_v37 = vsel %vm426_vm14, %v908_v4, %v910_v14  ;;  %v873_v4 = vmul.f32 %v2104_v23, %v865_v56 }
 0x2b7   : > { %v931_v30 = vmul.f32 %v1253_v3, %v923_v37 }
 0x2b8   : > { %v912_v32 = vpop.permute.xlu0 %911 }
 0x2b9   : > { %v914_v26 = vpop.permute.xlu1 %913  ;;  %v935_v43 = vadd.f32 %v931_v30, %v874_v8  ;;  %v871_v8 = vmul.f32 %v2104_v23, %v863_v52  ;;  %v877_v23 = vadd.f32 %v873_v4, %v2030_v61 }
 0x2ba   : > { %v924_v22 = vsel %vm426_vm14, %v912_v32, %v914_v26  ;;  %v1018_v26 = vsel %vm582_vm13, %v1006_v15, %v1008_v12 }
 0x2bb   : > { %v932_v55 = vmul.f32 %v1253_v3, %v924_v22  ;;  %v875_v29 = vadd.f32 %v871_v8, %v2024_v60 }
 0x2bc   : > { %v916_v2 = vpop.permute.xlu0 %915 }
 0x2bd   : > { %v918_v36 = vpop.permute.xlu1 %917  ;;  %v936_v31 = vadd.f32 %v932_v55, %v875_v29 }
 0x2be   : > { %v925_v45 = vsel %vm426_vm14, %v916_v2, %v918_v36  ;;  %v1257_v36 = vld [vmem:[#allocation9 + $0xa] ss:$0 sm:$0xff] }
 0x2bf   : > { %v933_v28 = vmul.f32 %v1253_v3, %v925_v45 }
 0x2c0   : > { %v920_v27 = vpop.permute.xlu0 %919 }
 0x2c1   : > { %v922_v39 = vpop.permute.xlu1 %921  ;;  %v937_v16 = vadd.f32 %v933_v28, %v876_v20  ;;  %v1256_v20 = vld [vmem:[#allocation9 + $0x6] ss:$0 sm:$0xff]  ;;  %v1344_v28 = vld [vmem:[%s1664_s6] sm:$0xff] }
 0x2c2   : > { %v926_v11 = vsel %vm426_vm14, %v920_v27, %v922_v39 }
 0x2c3   : > { %v934_v60 = vmul.f32 %v1253_v3, %v926_v11  ;;  %v1020_v3 = vsel %vm582_vm13, %v2116_v13, %v2114_v0 }
 0x2c4   : > { %v965_v7 = vpop.permute.xlu0 %964 }
 0x2c5   : > { %v967_v40 = vpop.permute.xlu1 %966 }
 0x2c6   : > { %v980_v42 = vsel %vm426_vm14, %v965_v7, %v967_v40  ;;  %v1026_v40 = vmul.f32 %v2119_v41, %v1018_v26 }
 0x2c7   : > { %v988_v24 = vmul.f32 %v1254_v19, %v980_v42 }
 0x2c8   : > { %v969_v47 = vpop.permute.xlu0 %968 }
 0x2c9   : > { %v992_v48 = vadd.f32 %v988_v24, %v935_v43  ;;  %v971_v1 = vpop.permute.xlu1 %970 }
 0x2ca   : > { %v981_v54 = vsel %vm426_vm14, %v969_v47, %v971_v1 }
 0x2cb   : > { %v1029_v44 = vadd.f32 %v1025_v46, %v992_v48  ;;  %v989_v57 = vmul.f32 %v1254_v19, %v981_v54  ;;  %v938_v46 = vadd.f32 %v934_v60, %v877_v23 }
 0x2cc   : > { %v973_v10 = vpop.permute.xlu0 %972 }
 0x2cd   : > { %v975_v6 = vpop.permute.xlu1 %974  ;;  %v993_v2 = vadd.f32 %v989_v57, %v936_v31 }
 0x2ce   : > { %v982_v49 = vsel %vm426_vm14, %v973_v10, %v975_v6 }
 0x2cf   : > { %v990_v63 = vmul.f32 %v1254_v19, %v982_v49  ;;  %v1030_v42 = vadd.f32 %v1026_v40, %v993_v2 }
 0x2d0   : > { %v977_v17 = vpop.permute.xlu0 %976 }
 0x2d1   : > { %v994_v33 = vadd.f32 %v990_v63, %v937_v16  ;;  %v979_v5 = vpop.permute.xlu1 %978 }
 0x2d2   : > { %v983_v62 = vsel %vm426_vm14, %v977_v17, %v979_v5  ;;  %v1345_v5 = vld [vmem:[%s1664_s6 + $0x8] sm:$0xff] }
 0x2d3   : > { %v1031_v18 = vadd.f32 %v1027_v50, %v994_v33  ;;  %v991_v15 = vmul.f32 %v1254_v19, %v983_v62  ;;  %v1028_v50 = vmul.f32 %v2119_v41, %v1020_v3 }
 0x2d4   : > { %v1039_v51 = vpop.permute.xlu0 %1038 }
 0x2d5   : > { %v1041_v34 = vpop.permute.xlu1 %1040  ;;  %v995_v6 = vadd.f32 %v991_v15, %v938_v46 }
 0x2d6   : > { %v1054_v21 = vsel %vm582_vm13, %v1039_v51, %v1041_v34 }
 0x2d7   : > { %v1062_v14 = vmul.f32 %v1256_v20, %v1054_v21  ;;  %v1032_v51 = vadd.f32 %v1028_v50, %v995_v6 }
 0x2d8   : > { %v1043_v35 = vpop.permute.xlu0 %1042 }
 0x2d9   : > { %v1045_v25 = vpop.permute.xlu1 %1044  ;;  %v1066_v39 = vadd.f32 %v1062_v14, %v1029_v44 }
 0x2da   : > { %v1055_v32 = vsel %vm582_vm13, %v1043_v35, %v1045_v25 }
 0x2db   : > { %v1063_v27 = vmul.f32 %v1256_v20, %v1055_v32 }
 0x2dc   : > { %v1047_v53 = vpop.permute.xlu0 %1046 }
 0x2dd   : > { %v1049_v9 = vpop.permute.xlu1 %1048  ;;  %v1067_v1 = vadd.f32 %v1063_v27, %v1030_v42 }
 0x2de   : > { %v1056_v12 = vsel %vm582_vm13, %v1047_v53, %v1049_v9 }
 0x2df   : > { %v1064_v47 = vmul.f32 %v1256_v20, %v1056_v12 }
 0x2e0   : > { %v1051_v58 = vpop.permute.xlu0 %1050 }
 0x2e1   : > { %v1053_v38 = vpop.permute.xlu1 %1052  ;;  %v1068_v13 = vadd.f32 %v1064_v47, %v1031_v18  ;;  %v1346_v18 = vld [vmem:[%s1664_s6 + $0x10] sm:$0xff] }
 0x2e2   : > { %v1057_v19 = vsel %vm582_vm13, %v1051_v58, %v1053_v38 }
 0x2e3   : > { %v1065_v33 = vmul.f32 %v1256_v20, %v1057_v19  ;;  %v1347_v20 = vld [vmem:[%s1664_s6 + $0x18] sm:$0xff] }
 0x2e4   : > { %v1076_v30 = vpop.permute.xlu0 %1075 }
 0x2e5   : > { %v1078_v37 = vpop.permute.xlu1 %1077  ;;  %v1069_v8 = vadd.f32 %v1065_v33, %v1032_v51 }
 0x2e6   : > { %v1091_v59 = vsel %vm582_vm13, %v1076_v30, %v1078_v37 }
 0x2e7   : > { %v1099_v7 = vmul.f32 %v1257_v36, %v1091_v59 }
 0x2e8   : > { %v1080_v45 = vpop.permute.xlu0 %1079 }
 0x2e9   : > { %v1103_v43 = vadd.f32 %v1099_v7, %v1066_v39  ;;  %v1082_v24 = vpop.permute.xlu1 %1081 }
 0x2ea   : > { %v1092_v48 = vsel %vm582_vm13, %v1080_v45, %v1082_v24 }
 0x2eb   : > { %v1107_v61 = vadd.f32 %v1344_v28, %v1103_v43  ;;  %v1100_v44 = vmul.f32 %v1257_v36, %v1092_v48 }
 0x2ec   : > { %v1084_v63 = vpop.permute.xlu0 %1083 }
 0x2ed   : > { %v1111_v10 = vmax.f32 %v1107_v61, 0.0  ;;  %v1104_v49 = vadd.f32 %v1100_v44, %v1067_v1  ;;  %v1086_v16 = vpop.permute.xlu1 %1085 }
 0x2ee   : > { %v1093_v0 = vsel %vm582_vm13, %v1084_v63, %v1086_v16 }
 0x2ef   : > { %1115 = vst [vmem:[%s218_s27] sm:$0xff] %v1111_v10  ;;  %v1108_v17 = vadd.f32 %v1345_v5, %v1104_v49  ;;  %v1101_v34 = vmul.f32 %v1257_v36, %v1093_v0 }
 0x2f0   : > { %v1088_v22 = vpop.permute.xlu0 %1087 }
 0x2f1   : > { %v1112_v25 = vmax.f32 %v1108_v17, 0.0  ;;  %v1105_v35 = vadd.f32 %v1101_v34, %v1068_v13  ;;  %v1090_v52 = vpop.permute.xlu1 %1089 }
 0x2f2   : > { %v1094_v41 = vsel %vm582_vm13, %v1088_v22, %v1090_v52 }
 0x2f3   : > { %1116 = vst [vmem:[%s218_s27 + $0x8] sm:$0xff] %v1112_v25  ;;  %v1109_v9 = vadd.f32 %v1346_v18, %v1105_v35  ;;  %v1102_v53 = vmul.f32 %v1257_v36, %v1094_v41 }
 0x2f5   : > { %v1113_v54 = vmax.f32 %v1109_v9, 0.0  ;;  %v1106_v55 = vadd.f32 %v1102_v53, %v1069_v8 }
 0x2f7   : > { %1117 = vst [vmem:[%s218_s27 + $0x10] sm:$0xff] %v1113_v54  ;;  %v1110_v21 = vadd.f32 %v1347_v20, %v1106_v55 }
 0x2f9   : > { %v1114_v29 = vmax.f32 %v1110_v21, 0.0 }
 0x2fb   : > { %1118 = vst [vmem:[%s218_s27 + $0x18] sm:$0xff] %v1114_v29 }
 0x2fc   : > { %1441 = shalt.err (!%p1438_p9)
}
 0x2fd   : > { %s1442_s26 = scalar_lea.hbm %s2160_s17, 512  ;;  %s1446_s6 = scalar_lea.hbm %s2209_s3, 1024 }
 0x2fe   : > { %p1443_p13 = scmp.ne.s32.totalorder %s2160_s17, %s1442_s26  ;;  %p1447_p4 = scmp.lt.s32.totalorder %s2160_s17, %s2209_s3 }
 0x2ff   : > { %p1448_p8 = scmp.lt.s32.totalorder %s1446_s6, %s1442_s26 }
 0x300   : > { %p1444_p5 = pnand %p1443_p13, %p2225_p10 }
 0x301   : > { %p1449_p3 = por %p1448_p8, %p1447_p4 }
 0x302   : > { %p1445_p0 = pneg %p1444_p5 }
 0x304   : > { %p1450_p11 = pnand %p1449_p3, %p1445_p0 }
 0x306   : > { %1453 = shalt.err (!%p1450_p11)
}
 0x307   : > { %s1510_s27 = smov 128  }
 0x308   : > { %1278 = dma.vmem_to_hbm [thread:$0]  (%p2225_p10), %s2162_s29, 512, %s2160_s17, %s1120_s21, %s1510_s27, %s1510_s27, %s1506_s18  }
 0x309 PF: > { %s1149_s28 = sand.u32 1, %s1484_s12   ;;  %p2226_p1 = scmp.ne.s32.totalorder %s2215_s19, 0 }
 0x30a   : > { %p2227_p2 = scmp.ge.s32.totalorder %s1496_s15, 2  ;;  %s1150_s8 = scalar_lea.sflag [#allocation6], %s1149_s28 }
 0x30c   : > { %p1292_p6 = pnand %p2227_p2, %p2226_p1 }
 0x30e   : > { %p1293_p12 = pneg %p1292_p6 }
 0x310   : > { %1479 = dma.done.wait (%p1293_p12), %s1150_s8, 512  }
 0x311   : > { %1481 = vsyncadd (%p1293_p12), %s1150_s8, 4294966784  ;;  %p17_p7 = scmp.ge.s32.totalorder %s1603_s7, 4   ;;  %s2228_s12 = smov %s1488_s13 }
 0x312   : > { %s2229_s13 = smov %s1492_s14  ;;  %s2230_s14 = smov %s1619_s11 }
 0x313   : > { %s2231_s15 = smov %s1603_s7  ;;  %19 = sbr.rel (!%p17_p7) target bundleno = 6 (0x6), region = 95 }
 0x318   :  { %1155 = vsyncpa [#allocation5], 1 }
 0x319   :  { %1157 = vsyncpa [#allocation5 + $0x1], 1 }
 0x31a   :  { %1158 = vsyncpa [#allocation8], 1 }
 0x31b   :  { %1159 = vsyncpa [#allocation6], 1 }
 0x31c   :  { %1161 = vsyncpa [#allocation6 + $0x1], 1 }

</bundles_post_ra>
